<compile_context>
chip_gen: v5e
topology: v5e:2x2
jax: 0.10.0
libtpu: 0.0.40
codegen_flags: <defaults>
</compile_context>

<pallas_src>
import jax
import jax.numpy as jnp
from jax.experimental import pallas as pl
from jax.experimental.pallas import tpu as pltpu

INPUT_SIZE = 30
IN_PAD = 32        # input features padded to a sublane-friendly size
HIDDEN = 128
FC1 = 64
FC2 = 64
FC_PAD = 128       # fc1/fc2 widths padded to 128 lanes (zero-padded, exact)
OUT = 460
OUT_PAD = 512      # 460 padded to 512 for an unmasked lane-dense store
B_PAD = 8          # batch padded to 8 sublanes

# Packed-buffer row offsets.
#   w512: [0:32)=W_ih(pad) | [32:160)=W_hh | [160:288)=W_fc3(pad)   (bf16, 512 cols)
#   w128: [0:128)=W_fc1(pad) | [128:256)=W_fc2(pad)                 (bf16, 128 cols)
#   bias: row0=b_lstm | row1=b_fc1 | row2=b_fc2 | row3=b_fc3        (f32, 512 cols)
_W_HH_LO = IN_PAD
_W_HH_HI = IN_PAD + HIDDEN
_W_FC3_LO = IN_PAD + HIDDEN


def simple_lstm_kernel(x_ref, w512_ref, w128_ref, bias_ref, out_ref):
    # x_ref:    (T*8, 32)  bf16, time-major, batch padded to 8
    # w512_ref: (288, 512) bf16 packed [W_ih | W_hh | W_fc3], gate order (i,f,o,g)
    # w128_ref: (256, 128) bf16 packed [W_fc1 | W_fc2]
    # bias_ref: (4, 512)   f32  packed [b_lstm | b_fc1 | b_fc2 | b_fc3]
    # out_ref:  (8, 512)   f32
    T = x_ref.shape[0] // B_PAD

    # ---- hoisted input projection: one matmul + bias, off the serial path ----
    x_proj = (
        jnp.dot(x_ref[...], w512_ref[0:IN_PAD, :],
                preferred_element_type=jnp.float32)
        + bias_ref[0:1, :]
    ).reshape(T, B_PAD, 4 * HIDDEN)                       # (T, 8, 512) f32

    h = jnp.zeros((B_PAD, HIDDEN), jnp.float32)
    c = jnp.zeros((B_PAD, HIDDEN), jnp.float32)

    # Fully-unrolled static time loop. W_hh is re-read from the VMEM ref each
    # step (not hoisted) to avoid pinning 32 vregs of weights across the unroll.
    # TODO(synk): keep W_hh resident in the MXU via pltpu.matmul_push_rhs /
    # matmul_acc_lhs / matmul_pop (per-chip MXU tile management).
    for t in range(T):
        gates = x_proj[t] + jnp.dot(
            h.astype(jnp.bfloat16),
            w512_ref[_W_HH_LO:_W_HH_HI, :],
            preferred_element_type=jnp.float32,
        )                                                 # (8, 512) f32
        sig = jax.nn.sigmoid(gates[:, : 3 * HIDDEN])      # contiguous i | f | o
        g_g = jnp.tanh(gates[:, 3 * HIDDEN:])             # g
        i_g = sig[:, 0 * HIDDEN:1 * HIDDEN]
        f_g = sig[:, 1 * HIDDEN:2 * HIDDEN]
        o_g = sig[:, 2 * HIDDEN:3 * HIDDEN]
        c = f_g * c + i_g * g_g
        h = o_g * jnp.tanh(c)

    # ---- FC head on the final hidden state (all lane-dense 128/512 tiles) ----
    z1 = jnp.maximum(
        jnp.dot(h.astype(jnp.bfloat16), w128_ref[0:HIDDEN, :],
                preferred_element_type=jnp.float32) + bias_ref[1:2, :FC_PAD], 0.0)
    z2 = jnp.maximum(
        jnp.dot(z1.astype(jnp.bfloat16), w128_ref[HIDDEN:HIDDEN + FC_PAD, :],
                preferred_element_type=jnp.float32) + bias_ref[2:3, :FC_PAD], 0.0)
    out_ref[...] = (
        jnp.dot(z2.astype(jnp.bfloat16), w512_ref[_W_FC3_LO:, :],
                preferred_element_type=jnp.float32) + bias_ref[3:4, :]
    )


def simple_lstm_forward(x, kparams):
    """x: (B, T, 30) f32 (batch_first, like PyTorch). Returns (B, 460) f32."""
    B, T, F = x.shape
    assert B <= B_PAD, "this single-tile kernel handles up to 8 sequences; tile/grid for more"
    assert F == INPUT_SIZE

    # time-major, batch padded to 8 sublanes, features zero-padded to 32, bf16.
    x_tm = jnp.transpose(x, (1, 0, 2))                              # (T, B, 30)
    x_tm = jnp.pad(x_tm, ((0, 0), (0, B_PAD - B), (0, IN_PAD - F)))  # (T, 8, 32)
    x_tm = x_tm.reshape(T * B_PAD, IN_PAD).astype(jnp.bfloat16)

    vmem = pl.BlockSpec(memory_space=pltpu.MemorySpace.VMEM)
    out_padded = pl.pallas_call(
        simple_lstm_kernel,
        out_shape=jax.ShapeDtypeStruct((B_PAD, OUT_PAD), jnp.float32),
        in_specs=[vmem, vmem, vmem, vmem],
        out_specs=vmem,
    )(x_tm, kparams["w512"], kparams["w128"], kparams["bias"])
    return out_padded[:B, :OUT]


def init_params(key):
    """Deterministic synthetic parameters in PyTorch nn.LSTM / nn.Linear layout."""
    ks = jax.random.split(key, 10)
    s = 0.1
    return {
        "weight_ih": s * jax.random.normal(ks[0], (4 * HIDDEN, INPUT_SIZE), jnp.float32),
        "weight_hh": s * jax.random.normal(ks[1], (4 * HIDDEN, HIDDEN), jnp.float32),
        "bias_ih":   s * jax.random.normal(ks[2], (4 * HIDDEN,), jnp.float32),
        "bias_hh":   s * jax.random.normal(ks[3], (4 * HIDDEN,), jnp.float32),
        "fc1_w": s * jax.random.normal(ks[4], (FC1, HIDDEN), jnp.float32),
        "fc1_b": s * jax.random.normal(ks[5], (FC1,), jnp.float32),
        "fc2_w": s * jax.random.normal(ks[6], (FC2, FC1), jnp.float32),
        "fc2_b": s * jax.random.normal(ks[7], (FC2,), jnp.float32),
        "fc3_w": s * jax.random.normal(ks[8], (OUT, FC2), jnp.float32),
        "fc3_b": s * jax.random.normal(ks[9], (OUT,), jnp.float32),
    }


def prepare_params(p):
    """PyTorch layout -> packed kernel layout.

    Gate reorder (i,f,g,o) -> (i,f,o,g); transpose weights; zero-pad to
    sublane/lane-friendly shapes; pack into 3 buffers (2x bf16 weights,
    1x f32 biases) so the kernel has 4 input DMAs instead of 10.
    """
    perm = jnp.array([0, 1, 3, 2])  # i, f, o, g

    def reorder(w):  # w: (4H, X) stacked [i; f; g; o] -> [i; f; o; g]
        return w.reshape(4, HIDDEN, w.shape[-1])[perm].reshape(4 * HIDDEN, w.shape[-1])

    # 512-wide bf16 slab: W_ih (padded to 32 rows) | W_hh | W_fc3 (padded 128x512)
    w_ih = jnp.pad(reorder(p["weight_ih"]).T, ((0, IN_PAD - INPUT_SIZE), (0, 0)))
    w_hh = reorder(p["weight_hh"]).T
    w_fc3 = jnp.pad(p["fc3_w"].T, ((0, FC_PAD - FC2), (0, OUT_PAD - OUT)))
    w512 = jnp.concatenate([w_ih, w_hh, w_fc3], axis=0).astype(jnp.bfloat16)  # (288, 512)

    # 128-wide bf16 slab: W_fc1 (128x128 padded) | W_fc2 (128x128 padded)
    w_fc1 = jnp.pad(p["fc1_w"].T, ((0, 0), (0, FC_PAD - FC1)))
    w_fc2 = jnp.pad(p["fc2_w"].T, ((0, FC_PAD - FC1), (0, FC_PAD - FC2)))
    w128 = jnp.concatenate([w_fc1, w_fc2], axis=0).astype(jnp.bfloat16)       # (256, 128)

    # f32 bias slab (4, 512): b_lstm | b_fc1 | b_fc2 | b_fc3 (zero-padded cols)
    b_lstm = (p["bias_ih"] + p["bias_hh"]).reshape(4, HIDDEN)[perm].reshape(4 * HIDDEN)
    b_fc1 = jnp.pad(p["fc1_b"], (0, OUT_PAD - FC1))
    b_fc2 = jnp.pad(p["fc2_b"], (0, OUT_PAD - FC2))
    b_fc3 = jnp.pad(p["fc3_b"], (0, OUT_PAD - OUT))
    bias = jnp.stack([b_lstm, b_fc1, b_fc2, b_fc3], axis=0).astype(jnp.float32)  # (4, 512)

    return {"w512": w512, "w128": w128, "bias": bias}


def reference_forward(x, p):
    """Pure-JAX f32 reference with PyTorch nn.LSTM gate order (i, f, g, o)."""
    B, T, _ = x.shape
    b = p["bias_ih"] + p["bias_hh"]
    h = jnp.zeros((B, HIDDEN), jnp.float32)
    c = jnp.zeros((B, HIDDEN), jnp.float32)
    for t in range(T):
        gates = x[:, t, :] @ p["weight_ih"].T + h @ p["weight_hh"].T + b
        i = jax.nn.sigmoid(gates[:, 0 * HIDDEN:1 * HIDDEN])
        f = jax.nn.sigmoid(gates[:, 1 * HIDDEN:2 * HIDDEN])
        g = jnp.tanh(gates[:, 2 * HIDDEN:3 * HIDDEN])
        o = jax.nn.sigmoid(gates[:, 3 * HIDDEN:4 * HIDDEN])
        c = f * c + i * g
        h = o * jnp.tanh(c)
    z1 = jax.nn.relu(h @ p["fc1_w"].T + p["fc1_b"])
    z2 = jax.nn.relu(z1 @ p["fc2_w"].T + p["fc2_b"])
    return z2 @ p["fc3_w"].T + p["fc3_b"]


if __name__ == "__main__":
    key = jax.random.PRNGKey(0)
    k_param, k_x = jax.random.split(key)

    B, T = 2, 8
    raw_params = init_params(k_param)
    kparams = prepare_params(raw_params)
    x = jax.random.normal(k_x, (B, T, INPUT_SIZE), jnp.float32)

    out = simple_lstm_forward(x, kparams)
    out = jax.block_until_ready(out)

    assert out.shape == (B, OUT), out.shape
    assert bool(jnp.all(jnp.isfinite(out)))

    # Loose check vs. f32 reference (bf16 matmuls introduce small drift).
    ref = reference_forward(x, raw_params)
    max_err = float(jnp.max(jnp.abs(out - ref)))
    assert max_err < 0.1, f"max abs error vs reference: {max_err}"

    print("KERNEL_OK")
</pallas_src>

<mosaic_0001>
module attributes {stable_mosaic.version = 11 : i64} {
  func.func @simple_lstm_kernel(%arg0: memref<64x32xbf16, #tpu.memory_space<vmem>>, %arg1: memref<288x512xbf16, #tpu.memory_space<vmem>>, %arg2: memref<256x128xbf16, #tpu.memory_space<vmem>>, %arg3: memref<4x512xf32, #tpu.memory_space<vmem>>, %arg4: memref<8x512xf32, #tpu.memory_space<vmem>>) attributes {dimension_semantics = [], scalar_prefetch = 0 : i64, scratch_operands = 0 : i64, tpu.core_type = #tpu.core_type<tc>} {
    %c0 = arith.constant 0 : index
    %c0_0 = arith.constant 0 : index
    %0 = vector.load %arg0[%c0, %c0_0] : memref<64x32xbf16, #tpu.memory_space<vmem>>, vector<64x32xbf16>
    %c0_1 = arith.constant 0 : index
    %c0_2 = arith.constant 0 : index
    %1 = vector.load %arg1[%c0_1, %c0_2] : memref<288x512xbf16, #tpu.memory_space<vmem>>, vector<32x512xbf16>
    %cst = arith.constant dense<0.000000e+00> : vector<64x512xf32>
    %2 = tpu.matmul %0, %1, %cst {dimension_numbers = #tpu.dot_dimension_numbers<[1], [0], [0], [1], [0, 0, 1, 1], [], []>} : vector<64x32xbf16>, vector<32x512xbf16>, vector<64x512xf32> -> vector<64x512xf32>
    %c0_3 = arith.constant 0 : index
    %c0_4 = arith.constant 0 : index
    %3 = vector.load %arg3[%c0_3, %c0_4] : memref<4x512xf32, #tpu.memory_space<vmem>>, vector<1x512xf32>
    %4 = vector.broadcast %3 : vector<1x512xf32> to vector<64x512xf32>
    %5 = arith.addf %2, %4 : vector<64x512xf32>
    %6 = vector.shape_cast %5 : vector<64x512xf32> to vector<8x8x512xf32>
    %cst_5 = arith.constant 0.000000e+00 : f32
    %7 = vector.broadcast %cst_5 : f32 to vector<8x128xf32>
    %cst_6 = arith.constant 0.000000e+00 : f32
    %8 = vector.broadcast %cst_6 : f32 to vector<8x128xf32>
    %9 = vector.extract_strided_slice %6 {offsets = [0, 0, 0], sizes = [1, 8, 512], strides = [1, 1, 1]} : vector<8x8x512xf32> to vector<1x8x512xf32>
    %10 = vector.shape_cast %9 : vector<1x8x512xf32> to vector<8x512xf32>
    %11 = arith.truncf %7 : vector<8x128xf32> to vector<8x128xbf16>
    %c32 = arith.constant 32 : index
    %c0_7 = arith.constant 0 : index
    %12 = vector.load %arg1[%c32, %c0_7] : memref<288x512xbf16, #tpu.memory_space<vmem>>, vector<128x512xbf16>
    %cst_8 = arith.constant dense<0.000000e+00> : vector<8x512xf32>
    %13 = tpu.matmul %11, %12, %cst_8 {dimension_numbers = #tpu.dot_dimension_numbers<[1], [0], [0], [1], [0, 0, 1, 1], [], []>} : vector<8x128xbf16>, vector<128x512xbf16>, vector<8x512xf32> -> vector<8x512xf32>
    %14 = arith.addf %10, %13 : vector<8x512xf32>
    %15 = vector.extract_strided_slice %14 {offsets = [0, 0], sizes = [8, 384], strides = [1, 1]} : vector<8x512xf32> to vector<8x384xf32>
    %16 = arith.negf %15 : vector<8x384xf32>
    %17 = math.exp %16 : vector<8x384xf32>
    %cst_9 = arith.constant 1.000000e+00 : f32
    %18 = vector.broadcast %cst_9 : f32 to vector<8x384xf32>
    %19 = arith.addf %18, %17 : vector<8x384xf32>
    %20 = arith.divf %18, %19 : vector<8x384xf32>
    %21 = vector.extract_strided_slice %14 {offsets = [0, 384], sizes = [8, 128], strides = [1, 1]} : vector<8x512xf32> to vector<8x128xf32>
    %22 = math.tanh %21 : vector<8x128xf32>
    %23 = vector.extract_strided_slice %20 {offsets = [0, 0], sizes = [8, 128], strides = [1, 1]} : vector<8x384xf32> to vector<8x128xf32>
    %24 = vector.extract_strided_slice %20 {offsets = [0, 128], sizes = [8, 128], strides = [1, 1]} : vector<8x384xf32> to vector<8x128xf32>
    %25 = vector.extract_strided_slice %20 {offsets = [0, 256], sizes = [8, 128], strides = [1, 1]} : vector<8x384xf32> to vector<8x128xf32>
    %26 = arith.mulf %24, %8 : vector<8x128xf32>
    %27 = arith.mulf %23, %22 : vector<8x128xf32>
    %28 = arith.addf %26, %27 : vector<8x128xf32>
    %29 = math.tanh %28 : vector<8x128xf32>
    %30 = arith.mulf %25, %29 : vector<8x128xf32>
    %31 = vector.extract_strided_slice %6 {offsets = [1, 0, 0], sizes = [1, 8, 512], strides = [1, 1, 1]} : vector<8x8x512xf32> to vector<1x8x512xf32>
    %32 = vector.shape_cast %31 : vector<1x8x512xf32> to vector<8x512xf32>
    %33 = arith.truncf %30 : vector<8x128xf32> to vector<8x128xbf16>
    %c32_10 = arith.constant 32 : index
    %c0_11 = arith.constant 0 : index
    %34 = vector.load %arg1[%c32_10, %c0_11] : memref<288x512xbf16, #tpu.memory_space<vmem>>, vector<128x512xbf16>
    %cst_12 = arith.constant dense<0.000000e+00> : vector<8x512xf32>
    %35 = tpu.matmul %33, %34, %cst_12 {dimension_numbers = #tpu.dot_dimension_numbers<[1], [0], [0], [1], [0, 0, 1, 1], [], []>} : vector<8x128xbf16>, vector<128x512xbf16>, vector<8x512xf32> -> vector<8x512xf32>
    %36 = arith.addf %32, %35 : vector<8x512xf32>
    %37 = vector.extract_strided_slice %36 {offsets = [0, 0], sizes = [8, 384], strides = [1, 1]} : vector<8x512xf32> to vector<8x384xf32>
    %38 = arith.negf %37 : vector<8x384xf32>
    %39 = math.exp %38 : vector<8x384xf32>
    %cst_13 = arith.constant 1.000000e+00 : f32
    %40 = vector.broadcast %cst_13 : f32 to vector<8x384xf32>
    %41 = arith.addf %40, %39 : vector<8x384xf32>
    %42 = arith.divf %40, %41 : vector<8x384xf32>
    %43 = vector.extract_strided_slice %36 {offsets = [0, 384], sizes = [8, 128], strides = [1, 1]} : vector<8x512xf32> to vector<8x128xf32>
    %44 = math.tanh %43 : vector<8x128xf32>
    %45 = vector.extract_strided_slice %42 {offsets = [0, 0], sizes = [8, 128], strides = [1, 1]} : vector<8x384xf32> to vector<8x128xf32>
    %46 = vector.extract_strided_slice %42 {offsets = [0, 128], sizes = [8, 128], strides = [1, 1]} : vector<8x384xf32> to vector<8x128xf32>
    %47 = vector.extract_strided_slice %42 {offsets = [0, 256], sizes = [8, 128], strides = [1, 1]} : vector<8x384xf32> to vector<8x128xf32>
    %48 = arith.mulf %46, %28 : vector<8x128xf32>
    %49 = arith.mulf %45, %44 : vector<8x128xf32>
    %50 = arith.addf %48, %49 : vector<8x128xf32>
    %51 = math.tanh %50 : vector<8x128xf32>
    %52 = arith.mulf %47, %51 : vector<8x128xf32>
    %53 = vector.extract_strided_slice %6 {offsets = [2, 0, 0], sizes = [1, 8, 512], strides = [1, 1, 1]} : vector<8x8x512xf32> to vector<1x8x512xf32>
    %54 = vector.shape_cast %53 : vector<1x8x512xf32> to vector<8x512xf32>
    %55 = arith.truncf %52 : vector<8x128xf32> to vector<8x128xbf16>
    %c32_14 = arith.constant 32 : index
    %c0_15 = arith.constant 0 : index
    %56 = vector.load %arg1[%c32_14, %c0_15] : memref<288x512xbf16, #tpu.memory_space<vmem>>, vector<128x512xbf16>
    %cst_16 = arith.constant dense<0.000000e+00> : vector<8x512xf32>
    %57 = tpu.matmul %55, %56, %cst_16 {dimension_numbers = #tpu.dot_dimension_numbers<[1], [0], [0], [1], [0, 0, 1, 1], [], []>} : vector<8x128xbf16>, vector<128x512xbf16>, vector<8x512xf32> -> vector<8x512xf32>
    %58 = arith.addf %54, %57 : vector<8x512xf32>
    %59 = vector.extract_strided_slice %58 {offsets = [0, 0], sizes = [8, 384], strides = [1, 1]} : vector<8x512xf32> to vector<8x384xf32>
    %60 = arith.negf %59 : vector<8x384xf32>
    %61 = math.exp %60 : vector<8x384xf32>
    %cst_17 = arith.constant 1.000000e+00 : f32
    %62 = vector.broadcast %cst_17 : f32 to vector<8x384xf32>
    %63 = arith.addf %62, %61 : vector<8x384xf32>
    %64 = arith.divf %62, %63 : vector<8x384xf32>
    %65 = vector.extract_strided_slice %58 {offsets = [0, 384], sizes = [8, 128], strides = [1, 1]} : vector<8x512xf32> to vector<8x128xf32>
    %66 = math.tanh %65 : vector<8x128xf32>
    %67 = vector.extract_strided_slice %64 {offsets = [0, 0], sizes = [8, 128], strides = [1, 1]} : vector<8x384xf32> to vector<8x128xf32>
    %68 = vector.extract_strided_slice %64 {offsets = [0, 128], sizes = [8, 128], strides = [1, 1]} : vector<8x384xf32> to vector<8x128xf32>
    %69 = vector.extract_strided_slice %64 {offsets = [0, 256], sizes = [8, 128], strides = [1, 1]} : vector<8x384xf32> to vector<8x128xf32>
    %70 = arith.mulf %68, %50 : vector<8x128xf32>
    %71 = arith.mulf %67, %66 : vector<8x128xf32>
    %72 = arith.addf %70, %71 : vector<8x128xf32>
    %73 = math.tanh %72 : vector<8x128xf32>
    %74 = arith.mulf %69, %73 : vector<8x128xf32>
    %75 = vector.extract_strided_slice %6 {offsets = [3, 0, 0], sizes = [1, 8, 512], strides = [1, 1, 1]} : vector<8x8x512xf32> to vector<1x8x512xf32>
    %76 = vector.shape_cast %75 : vector<1x8x512xf32> to vector<8x512xf32>
    %77 = arith.truncf %74 : vector<8x128xf32> to vector<8x128xbf16>
    %c32_18 = arith.constant 32 : index
    %c0_19 = arith.constant 0 : index
    %78 = vector.load %arg1[%c32_18, %c0_19] : memref<288x512xbf16, #tpu.memory_space<vmem>>, vector<128x512xbf16>
    %cst_20 = arith.constant dense<0.000000e+00> : vector<8x512xf32>
    %79 = tpu.matmul %77, %78, %cst_20 {dimension_numbers = #tpu.dot_dimension_numbers<[1], [0], [0], [1], [0, 0, 1, 1], [], []>} : vector<8x128xbf16>, vector<128x512xbf16>, vector<8x512xf32> -> vector<8x512xf32>
    %80 = arith.addf %76, %79 : vector<8x512xf32>
    %81 = vector.extract_strided_slice %80 {offsets = [0, 0], sizes = [8, 384], strides = [1, 1]} : vector<8x512xf32> to vector<8x384xf32>
    %82 = arith.negf %81 : vector<8x384xf32>
    %83 = math.exp %82 : vector<8x384xf32>
    %cst_21 = arith.constant 1.000000e+00 : f32
    %84 = vector.broadcast %cst_21 : f32 to vector<8x384xf32>
    %85 = arith.addf %84, %83 : vector<8x384xf32>
    %86 = arith.divf %84, %85 : vector<8x384xf32>
    %87 = vector.extract_strided_slice %80 {offsets = [0, 384], sizes = [8, 128], strides = [1, 1]} : vector<8x512xf32> to vector<8x128xf32>
    %88 = math.tanh %87 : vector<8x128xf32>
    %89 = vector.extract_strided_slice %86 {offsets = [0, 0], sizes = [8, 128], strides = [1, 1]} : vector<8x384xf32> to vector<8x128xf32>
    %90 = vector.extract_strided_slice %86 {offsets = [0, 128], sizes = [8, 128], strides = [1, 1]} : vector<8x384xf32> to vector<8x128xf32>
    %91 = vector.extract_strided_slice %86 {offsets = [0, 256], sizes = [8, 128], strides = [1, 1]} : vector<8x384xf32> to vector<8x128xf32>
    %92 = arith.mulf %90, %72 : vector<8x128xf32>
    %93 = arith.mulf %89, %88 : vector<8x128xf32>
    %94 = arith.addf %92, %93 : vector<8x128xf32>
    %95 = math.tanh %94 : vector<8x128xf32>
    %96 = arith.mulf %91, %95 : vector<8x128xf32>
    %97 = vector.extract_strided_slice %6 {offsets = [4, 0, 0], sizes = [1, 8, 512], strides = [1, 1, 1]} : vector<8x8x512xf32> to vector<1x8x512xf32>
    %98 = vector.shape_cast %97 : vector<1x8x512xf32> to vector<8x512xf32>
    %99 = arith.truncf %96 : vector<8x128xf32> to vector<8x128xbf16>
    %c32_22 = arith.constant 32 : index
    %c0_23 = arith.constant 0 : index
    %100 = vector.load %arg1[%c32_22, %c0_23] : memref<288x512xbf16, #tpu.memory_space<vmem>>, vector<128x512xbf16>
    %cst_24 = arith.constant dense<0.000000e+00> : vector<8x512xf32>
    %101 = tpu.matmul %99, %100, %cst_24 {dimension_numbers = #tpu.dot_dimension_numbers<[1], [0], [0], [1], [0, 0, 1, 1], [], []>} : vector<8x128xbf16>, vector<128x512xbf16>, vector<8x512xf32> -> vector<8x512xf32>
    %102 = arith.addf %98, %101 : vector<8x512xf32>
    %103 = vector.extract_strided_slice %102 {offsets = [0, 0], sizes = [8, 384], strides = [1, 1]} : vector<8x512xf32> to vector<8x384xf32>
    %104 = arith.negf %103 : vector<8x384xf32>
    %105 = math.exp %104 : vector<8x384xf32>
    %cst_25 = arith.constant 1.000000e+00 : f32
    %106 = vector.broadcast %cst_25 : f32 to vector<8x384xf32>
    %107 = arith.addf %106, %105 : vector<8x384xf32>
    %108 = arith.divf %106, %107 : vector<8x384xf32>
    %109 = vector.extract_strided_slice %102 {offsets = [0, 384], sizes = [8, 128], strides = [1, 1]} : vector<8x512xf32> to vector<8x128xf32>
    %110 = math.tanh %109 : vector<8x128xf32>
    %111 = vector.extract_strided_slice %108 {offsets = [0, 0], sizes = [8, 128], strides = [1, 1]} : vector<8x384xf32> to vector<8x128xf32>
    %112 = vector.extract_strided_slice %108 {offsets = [0, 128], sizes = [8, 128], strides = [1, 1]} : vector<8x384xf32> to vector<8x128xf32>
    %113 = vector.extract_strided_slice %108 {offsets = [0, 256], sizes = [8, 128], strides = [1, 1]} : vector<8x384xf32> to vector<8x128xf32>
    %114 = arith.mulf %112, %94 : vector<8x128xf32>
    %115 = arith.mulf %111, %110 : vector<8x128xf32>
    %116 = arith.addf %114, %115 : vector<8x128xf32>
    %117 = math.tanh %116 : vector<8x128xf32>
    %118 = arith.mulf %113, %117 : vector<8x128xf32>
    %119 = vector.extract_strided_slice %6 {offsets = [5, 0, 0], sizes = [1, 8, 512], strides = [1, 1, 1]} : vector<8x8x512xf32> to vector<1x8x512xf32>
    %120 = vector.shape_cast %119 : vector<1x8x512xf32> to vector<8x512xf32>
    %121 = arith.truncf %118 : vector<8x128xf32> to vector<8x128xbf16>
    %c32_26 = arith.constant 32 : index
    %c0_27 = arith.constant 0 : index
    %122 = vector.load %arg1[%c32_26, %c0_27] : memref<288x512xbf16, #tpu.memory_space<vmem>>, vector<128x512xbf16>
    %cst_28 = arith.constant dense<0.000000e+00> : vector<8x512xf32>
    %123 = tpu.matmul %121, %122, %cst_28 {dimension_numbers = #tpu.dot_dimension_numbers<[1], [0], [0], [1], [0, 0, 1, 1], [], []>} : vector<8x128xbf16>, vector<128x512xbf16>, vector<8x512xf32> -> vector<8x512xf32>
    %124 = arith.addf %120, %123 : vector<8x512xf32>
    %125 = vector.extract_strided_slice %124 {offsets = [0, 0], sizes = [8, 384], strides = [1, 1]} : vector<8x512xf32> to vector<8x384xf32>
    %126 = arith.negf %125 : vector<8x384xf32>
    %127 = math.exp %126 : vector<8x384xf32>
    %cst_29 = arith.constant 1.000000e+00 : f32
    %128 = vector.broadcast %cst_29 : f32 to vector<8x384xf32>
    %129 = arith.addf %128, %127 : vector<8x384xf32>
    %130 = arith.divf %128, %129 : vector<8x384xf32>
    %131 = vector.extract_strided_slice %124 {offsets = [0, 384], sizes = [8, 128], strides = [1, 1]} : vector<8x512xf32> to vector<8x128xf32>
    %132 = math.tanh %131 : vector<8x128xf32>
    %133 = vector.extract_strided_slice %130 {offsets = [0, 0], sizes = [8, 128], strides = [1, 1]} : vector<8x384xf32> to vector<8x128xf32>
    %134 = vector.extract_strided_slice %130 {offsets = [0, 128], sizes = [8, 128], strides = [1, 1]} : vector<8x384xf32> to vector<8x128xf32>
    %135 = vector.extract_strided_slice %130 {offsets = [0, 256], sizes = [8, 128], strides = [1, 1]} : vector<8x384xf32> to vector<8x128xf32>
    %136 = arith.mulf %134, %116 : vector<8x128xf32>
    %137 = arith.mulf %133, %132 : vector<8x128xf32>
    %138 = arith.addf %136, %137 : vector<8x128xf32>
    %139 = math.tanh %138 : vector<8x128xf32>
    %140 = arith.mulf %135, %139 : vector<8x128xf32>
    %141 = vector.extract_strided_slice %6 {offsets = [6, 0, 0], sizes = [1, 8, 512], strides = [1, 1, 1]} : vector<8x8x512xf32> to vector<1x8x512xf32>
    %142 = vector.shape_cast %141 : vector<1x8x512xf32> to vector<8x512xf32>
    %143 = arith.truncf %140 : vector<8x128xf32> to vector<8x128xbf16>
    %c32_30 = arith.constant 32 : index
    %c0_31 = arith.constant 0 : index
    %144 = vector.load %arg1[%c32_30, %c0_31] : memref<288x512xbf16, #tpu.memory_space<vmem>>, vector<128x512xbf16>
    %cst_32 = arith.constant dense<0.000000e+00> : vector<8x512xf32>
    %145 = tpu.matmul %143, %144, %cst_32 {dimension_numbers = #tpu.dot_dimension_numbers<[1], [0], [0], [1], [0, 0, 1, 1], [], []>} : vector<8x128xbf16>, vector<128x512xbf16>, vector<8x512xf32> -> vector<8x512xf32>
    %146 = arith.addf %142, %145 : vector<8x512xf32>
    %147 = vector.extract_strided_slice %146 {offsets = [0, 0], sizes = [8, 384], strides = [1, 1]} : vector<8x512xf32> to vector<8x384xf32>
    %148 = arith.negf %147 : vector<8x384xf32>
    %149 = math.exp %148 : vector<8x384xf32>
    %cst_33 = arith.constant 1.000000e+00 : f32
    %150 = vector.broadcast %cst_33 : f32 to vector<8x384xf32>
    %151 = arith.addf %150, %149 : vector<8x384xf32>
    %152 = arith.divf %150, %151 : vector<8x384xf32>
    %153 = vector.extract_strided_slice %146 {offsets = [0, 384], sizes = [8, 128], strides = [1, 1]} : vector<8x512xf32> to vector<8x128xf32>
    %154 = math.tanh %153 : vector<8x128xf32>
    %155 = vector.extract_strided_slice %152 {offsets = [0, 0], sizes = [8, 128], strides = [1, 1]} : vector<8x384xf32> to vector<8x128xf32>
    %156 = vector.extract_strided_slice %152 {offsets = [0, 128], sizes = [8, 128], strides = [1, 1]} : vector<8x384xf32> to vector<8x128xf32>
    %157 = vector.extract_strided_slice %152 {offsets = [0, 256], sizes = [8, 128], strides = [1, 1]} : vector<8x384xf32> to vector<8x128xf32>
    %158 = arith.mulf %156, %138 : vector<8x128xf32>
    %159 = arith.mulf %155, %154 : vector<8x128xf32>
    %160 = arith.addf %158, %159 : vector<8x128xf32>
    %161 = math.tanh %160 : vector<8x128xf32>
    %162 = arith.mulf %157, %161 : vector<8x128xf32>
    %163 = vector.extract_strided_slice %6 {offsets = [7, 0, 0], sizes = [1, 8, 512], strides = [1, 1, 1]} : vector<8x8x512xf32> to vector<1x8x512xf32>
    %164 = vector.shape_cast %163 : vector<1x8x512xf32> to vector<8x512xf32>
    %165 = arith.truncf %162 : vector<8x128xf32> to vector<8x128xbf16>
    %c32_34 = arith.constant 32 : index
    %c0_35 = arith.constant 0 : index
    %166 = vector.load %arg1[%c32_34, %c0_35] : memref<288x512xbf16, #tpu.memory_space<vmem>>, vector<128x512xbf16>
    %cst_36 = arith.constant dense<0.000000e+00> : vector<8x512xf32>
    %167 = tpu.matmul %165, %166, %cst_36 {dimension_numbers = #tpu.dot_dimension_numbers<[1], [0], [0], [1], [0, 0, 1, 1], [], []>} : vector<8x128xbf16>, vector<128x512xbf16>, vector<8x512xf32> -> vector<8x512xf32>
    %168 = arith.addf %164, %167 : vector<8x512xf32>
    %169 = vector.extract_strided_slice %168 {offsets = [0, 0], sizes = [8, 384], strides = [1, 1]} : vector<8x512xf32> to vector<8x384xf32>
    %170 = arith.negf %169 : vector<8x384xf32>
    %171 = math.exp %170 : vector<8x384xf32>
    %cst_37 = arith.constant 1.000000e+00 : f32
    %172 = vector.broadcast %cst_37 : f32 to vector<8x384xf32>
    %173 = arith.addf %172, %171 : vector<8x384xf32>
    %174 = arith.divf %172, %173 : vector<8x384xf32>
    %175 = vector.extract_strided_slice %168 {offsets = [0, 384], sizes = [8, 128], strides = [1, 1]} : vector<8x512xf32> to vector<8x128xf32>
    %176 = math.tanh %175 : vector<8x128xf32>
    %177 = vector.extract_strided_slice %174 {offsets = [0, 0], sizes = [8, 128], strides = [1, 1]} : vector<8x384xf32> to vector<8x128xf32>
    %178 = vector.extract_strided_slice %174 {offsets = [0, 128], sizes = [8, 128], strides = [1, 1]} : vector<8x384xf32> to vector<8x128xf32>
    %179 = vector.extract_strided_slice %174 {offsets = [0, 256], sizes = [8, 128], strides = [1, 1]} : vector<8x384xf32> to vector<8x128xf32>
    %180 = arith.mulf %178, %160 : vector<8x128xf32>
    %181 = arith.mulf %177, %176 : vector<8x128xf32>
    %182 = arith.addf %180, %181 : vector<8x128xf32>
    %183 = math.tanh %182 : vector<8x128xf32>
    %184 = arith.mulf %179, %183 : vector<8x128xf32>
    %185 = arith.truncf %184 : vector<8x128xf32> to vector<8x128xbf16>
    %c0_38 = arith.constant 0 : index
    %c0_39 = arith.constant 0 : index
    %186 = vector.load %arg2[%c0_38, %c0_39] : memref<256x128xbf16, #tpu.memory_space<vmem>>, vector<128x128xbf16>
    %cst_40 = arith.constant dense<0.000000e+00> : vector<8x128xf32>
    %187 = tpu.matmul %185, %186, %cst_40 {dimension_numbers = #tpu.dot_dimension_numbers<[1], [0], [0], [1], [0, 0, 1, 1], [], []>} : vector<8x128xbf16>, vector<128x128xbf16>, vector<8x128xf32> -> vector<8x128xf32>
    %c1 = arith.constant 1 : index
    %c0_41 = arith.constant 0 : index
    %188 = vector.load %arg3[%c1, %c0_41] : memref<4x512xf32, #tpu.memory_space<vmem>>, vector<1x128xf32>
    %189 = vector.broadcast %188 : vector<1x128xf32> to vector<8x128xf32>
    %190 = arith.addf %187, %189 : vector<8x128xf32>
    %cst_42 = arith.constant 0.000000e+00 : f32
    %191 = vector.broadcast %cst_42 : f32 to vector<8x128xf32>
    %192 = arith.maximumf %190, %191 : vector<8x128xf32>
    %193 = arith.truncf %192 : vector<8x128xf32> to vector<8x128xbf16>
    %c128 = arith.constant 128 : index
    %c0_43 = arith.constant 0 : index
    %194 = vector.load %arg2[%c128, %c0_43] : memref<256x128xbf16, #tpu.memory_space<vmem>>, vector<128x128xbf16>
    %cst_44 = arith.constant dense<0.000000e+00> : vector<8x128xf32>
    %195 = tpu.matmul %193, %194, %cst_44 {dimension_numbers = #tpu.dot_dimension_numbers<[1], [0], [0], [1], [0, 0, 1, 1], [], []>} : vector<8x128xbf16>, vector<128x128xbf16>, vector<8x128xf32> -> vector<8x128xf32>
    %c2 = arith.constant 2 : index
    %c0_45 = arith.constant 0 : index
    %196 = vector.load %arg3[%c2, %c0_45] : memref<4x512xf32, #tpu.memory_space<vmem>>, vector<1x128xf32>
    %197 = vector.broadcast %196 : vector<1x128xf32> to vector<8x128xf32>
    %198 = arith.addf %195, %197 : vector<8x128xf32>
    %cst_46 = arith.constant 0.000000e+00 : f32
    %199 = vector.broadcast %cst_46 : f32 to vector<8x128xf32>
    %200 = arith.maximumf %198, %199 : vector<8x128xf32>
    %201 = arith.truncf %200 : vector<8x128xf32> to vector<8x128xbf16>
    %c160 = arith.constant 160 : index
    %c0_47 = arith.constant 0 : index
    %202 = vector.load %arg1[%c160, %c0_47] : memref<288x512xbf16, #tpu.memory_space<vmem>>, vector<128x512xbf16>
    %cst_48 = arith.constant dense<0.000000e+00> : vector<8x512xf32>
    %203 = tpu.matmul %201, %202, %cst_48 {dimension_numbers = #tpu.dot_dimension_numbers<[1], [0], [0], [1], [0, 0, 1, 1], [], []>} : vector<8x128xbf16>, vector<128x512xbf16>, vector<8x512xf32> -> vector<8x512xf32>
    %c3 = arith.constant 3 : index
    %c0_49 = arith.constant 0 : index
    %204 = vector.load %arg3[%c3, %c0_49] : memref<4x512xf32, #tpu.memory_space<vmem>>, vector<1x512xf32>
    %205 = vector.broadcast %204 : vector<1x512xf32> to vector<8x512xf32>
    %206 = arith.addf %203, %205 : vector<8x512xf32>
    %c0_50 = arith.constant 0 : index
    %c0_51 = arith.constant 0 : index
    %207 = vector.load %arg4[%c0_50, %c0_51] : memref<8x512xf32, #tpu.memory_space<vmem>>, vector<8x512xf32>
    tpu.vector_store %arg4[%c0_50, %c0_51], %206 {strides = array<i32>} : memref<8x512xf32, #tpu.memory_space<vmem>>, vector<8x512xf32>,
    return
  }
}

</mosaic_0001>

<bundles_post_ra>
// kernel: tpu_custom_call.1
= control target key start
LH: loop header
LB: loop body
LE: loop exit
PB: predicated region body
PF: predicated region fallthrough
CT: control target
= control target key end

     0   :  { %9 = vsyncpa [#allocation3], 0  ;;  %s3156_s0 = inlined_call_operand.vmem [shape: bf16[64,32], index: 0, kind: input, shape index: {}]   ;;  %s3157_s1 = inlined_call_operand.hbm [shape: bf16[288,512], index: 1, kind: input, shape index: {}]   ;;  %s3158_s2 = inlined_call_operand.hbm [shape: bf16[256,128], index: 2, kind: input, shape index: {}]   ;;  %s3159_s3 = inlined_call_operand.vmem [shape: f32[4,512], index: 3, kind: input, shape index: {}]   ;;  %s3160_s4 = inlined_call_operand.hbm [shape: f32[8,512], index: 4, kind: output, shape index: {}]  }
   0x1   :  { %10 = vsyncpa [#allocation6], 0 }
   0x2   :  { %11 = vsyncpa [#allocation4], 0  ;;  %s18_s17 = sshll.u32 %s3157_s1, 4  ;;  %s2578_s18 = smov [#allocation2]   ;;  %s19_s17 = int_to_ptr.hbm [resolvable:$true] %s18_s17 }
   0x3   :  { %s20_s19 = sshll.u32 %s2578_s18, 4  ;;  %s31_s22 = sshll.u32 %s3158_s2, 4  ;;  %s21_s19 = int_to_ptr.vmem [resolvable:$true] %s20_s19  ;;  %s32_s22 = int_to_ptr.hbm [resolvable:$true] %s31_s22 }
   0x4   :  { %s2579_s23 = smov 256   ;;  %s2580_s24 = smov 16  }
   0x5   :  { %26 = dma.hbm_to_vmem [thread:$0]  %s19_s17, 9216, %s21_s19, [#allocation3], %s2579_s23, %s2579_s23, %s2580_s24  }
   0x6   :  { %s2581_s25 = smov [#allocation5]   ;;  %s2582_s27 = smov 64  }
   0x7   :  { %s33_s26 = sshll.u32 %s2581_s25, 4  ;;  %s2583_s28 = smov 4   ;;  %s34_s26 = int_to_ptr.vmem [resolvable:$true] %s33_s26 }
   0x8   :  { %39 = dma.hbm_to_vmem [thread:$0]  %s32_s22, 2048, %s34_s26, [#allocation6], %s2582_s27, %s2582_s27, %s2583_s28  }
   0x9   :  { %2572 = dma.done.wait [#allocation3], 9216  }
   0xa   :  { %2573 = vsyncadd [#allocation3], 4294958080 }
   0xb   :  { %2574 = dma.done.wait [#allocation6], 2048  }
   0xc   :  { %2575 = vsyncadd [#allocation6], 4294965248  ;;  %v1891_v0 = vld [vmem:[#allocation2 + $0x20] sm:$0xf]  ;;  %v2276_v1 = vld [vmem:[#allocation2 + $0x2c] sm:$0xf0] }
   0xd   :  { %v2274_v2 = vld [vmem:[#allocation2 + $0x24] sm:$0xf]  ;;  %v1892_v3 = vor.u32 %v2276_v1, %v1891_v0  ;;  %v1893_v4 = vld [vmem:[#allocation2 + $0x30] sm:$0xf0]  ;;  %v1875_v5 = vld [vmem:[#allocation2] sm:$0xf] }
   0xe   :  { %v2272_v6 = vld [vmem:[#allocation2 + $0xc] sm:$0xf0]  ;;  %v1896_v7 = vor.u32 %v2274_v2, %v1893_v4  ;;  %v2270_v8 = vld [vmem:[#allocation2 + $0x4] sm:$0xf]  ;;  %v1877_v9 = vld [vmem:[#allocation2 + $0x10] sm:$0xf0] }
   0xf   :  { %156 = vmatpush.bf16.msra.mxu0 %v1892_v3  ;;  %2358 = vmatpush.bf16.msra.mxu2 %v1892_v3  ;;  %v1876_v10 = vor.u32 %v2272_v6, %v1875_v5  ;;  %v1899_v11 = vld [vmem:[#allocation2 + $0x28] sm:$0xf]  ;;  %v2277_v12 = vld [vmem:[#allocation2 + $0x34] sm:$0xf0]  ;;  %v1880_v13 = vor.u32 %v2270_v8, %v1877_v9  ;;  %v2620_v14 = vld [vmem:[%s3156_s0] sm:$0xff]  ;;  %vm137_vm0 = vcmask 261120  }
  0x10   :  { %185 = vmatpush.bf16.msra.mxu1 %v1896_v7  ;;  %2360 = vmatpush.bf16.msra.mxu3 %v1896_v7  ;;  %v2625_v15 = vld [vmem:[%s3156_s0 + $0x18] sm:$0xff]  ;;  %v1883_v16 = vld [vmem:[#allocation2 + $0x8] sm:$0xf]  ;;  %v2275_v17 = vld [vmem:[#allocation2 + $0x2c] sm:$0xf]  ;;  %v1900_v18 = vor.u32 %v2277_v12, %v1899_v11  ;;  %s2585_s16 = smov [#allocation7]  }
  0x11   :  { %v2273_v19 = vld [vmem:[#allocation2 + $0x14] sm:$0xf0]  ;;  %v1901_v20 = vld [vmem:[#allocation2 + $0x38] sm:$0xf0]  ;;  %v2271_v21 = vld [vmem:[#allocation2 + $0xc] sm:$0xf] }
  0x12   :  { %v1904_v22 = vor.u32 %v2275_v17, %v1901_v20  ;;  %v1885_v23 = vld [vmem:[#allocation2 + $0x18] sm:$0xf0]  ;;  %v2043_v24 = vld [vmem:[#allocation2 + $0x128] sm:$0xf]  ;;  %v2309_v25 = vld [vmem:[#allocation2 + $0x134] sm:$0xf0]  ;;  %v1884_v32 = vor.u32 %v2273_v19, %v1883_v16 }
  0x13   :  { %157 = vmatpush.bf16.msra.mxu0 %v1876_v10  ;;  %2359 = vmatpush.bf16.msra.mxu2 %v1876_v10  ;;  %v2035_v26 = vld [vmem:[#allocation2 + $0x120] sm:$0xf]  ;;  %v2308_v27 = vld [vmem:[#allocation2 + $0x12c] sm:$0xf0]  ;;  %v2306_v28 = vld [vmem:[#allocation2 + $0x124] sm:$0xf]  ;;  %v1888_v33 = vor.u32 %v2271_v21, %v1885_v23  ;;  %v2635_v38 = vor.u32 %v2309_v25, %v2043_v24 }
  0x14   :  { %186 = vmatpush.bf16.msra.mxu1 %v1880_v13  ;;  %2361 = vmatpush.bf16.msra.mxu3 %v1880_v13  ;;  %v2627_v29 = vor.u32 %v2308_v27, %v2035_v26  ;;  %v2037_v30 = vld [vmem:[#allocation2 + $0x130] sm:$0xf0]  ;;  %v2019_v31 = vld [vmem:[#allocation2 + $0x100] sm:$0xf]  ;;  %v2304_v35 = vld [vmem:[#allocation2 + $0x10c] sm:$0xf0] }
  0x15   :  { %v2629_v34 = vor.u32 %v2306_v28, %v2037_v30  ;;  %v2302_v36 = vld [vmem:[#allocation2 + $0x104] sm:$0xf]  ;;  %v2021_v37 = vld [vmem:[#allocation2 + $0x110] sm:$0xf0]  ;;  %v2027_v39 = vld [vmem:[#allocation2 + $0x108] sm:$0xf]  ;;  %v2643_v42 = vor.u32 %v2304_v35, %v2019_v31 }
  0x16   :  { %1905 = vmatmul.msk.bf16.vlgmr.msra.gmra.mxu0 %vm137_vm0, %v2620_v14  ;;  %1908 = vmatmul.msk.bf16.vlgmr.msra.gmra.mxu2 %vm137_vm0, %v2625_v15  ;;  %v2305_v40 = vld [vmem:[#allocation2 + $0x114] sm:$0xf0]  ;;  %v2307_v41 = vld [vmem:[#allocation2 + $0x12c] sm:$0xf]  ;;  %v2645_v43 = vor.u32 %v2302_v36, %v2021_v37  ;;  %v2003_v44 = vld [vmem:[#allocation2 + $0xe0] sm:$0xf] }
  0x17   :  { %214 = vmatpush.bf16.msrb.mxu2 %v1900_v18  ;;  %1909 = vmatmul.msk.bf16.vlgmr.msra.gmra.mxu1 %vm137_vm0, %v2620_v14  ;;  %v2045_v45 = vld [vmem:[#allocation2 + $0x138] sm:$0xf0]  ;;  %v2300_v46 = vld [vmem:[#allocation2 + $0xec] sm:$0xf0]  ;;  %v2298_v47 = vld [vmem:[#allocation2 + $0xe4] sm:$0xf]  ;;  %v2650_v50 = vor.u32 %v2305_v40, %v2027_v39 }
  0x18   :  { %243 = vmatpush.bf16.msrb.mxu3 %v1904_v22  ;;  %458 = vmatpush.bf16.msrb.mxu0 %v2627_v29  ;;  %v2005_v48 = vld [vmem:[#allocation2 + $0xf0] sm:$0xf0]  ;;  %v2647_v49 = vor.u32 %v2307_v41, %v2045_v45  ;;  %v2011_v51 = vld [vmem:[#allocation2 + $0xe8] sm:$0xf]  ;;  %v2301_v52 = vld [vmem:[#allocation2 + $0xf4] sm:$0xf0]  ;;  %v2655_v53 = vor.u32 %v2300_v46, %v2003_v44 }
  0x19   :  { %1912 = vmatmul.msk.bf16.vlgmr.msra.gmra.mxu3 %vm137_vm0, %v2625_v15  ;;  %471 = vmatpush.bf16.msrb.mxu1 %v2629_v34  ;;  %v2657_v54 = vor.u32 %v2298_v47, %v2005_v48  ;;  %v1987_v55 = vld [vmem:[#allocation2 + $0xc0] sm:$0xf]  ;;  %v2303_v56 = vld [vmem:[#allocation2 + $0x10c] sm:$0xf]  ;;  %v2029_v57 = vld [vmem:[#allocation2 + $0x118] sm:$0xf0]  ;;  %v2662_v62 = vor.u32 %v2301_v52, %v2011_v51 }
  0x1a   :  { %v2296_v58 = vld [vmem:[#allocation2 + $0xcc] sm:$0xf0]  ;;  %v2294_v59 = vld [vmem:[#allocation2 + $0xc4] sm:$0xf]  ;;  %v1989_v60 = vld [vmem:[#allocation2 + $0xd0] sm:$0xf0]  ;;  %v2659_v61 = vor.u32 %v2303_v56, %v2029_v57 }
  0x1b   :  { %215 = vmatpush.bf16.msrb.mxu2 %v1884_v32  ;;  %v1971_v63 = vld [vmem:[#allocation2 + $0xa0] sm:$0xf]  ;;  %v2668_v0 = vld [vmem:[%s3156_s0 + $0x8] sm:$0xff]  ;;  %v2672_v1 = vor.u32 %v2296_v58, %v1987_v55  ;;  %v2674_v2 = vor.u32 %v2294_v59, %v1989_v60  ;;  %v2292_v3 = vld [vmem:[#allocation2 + $0xac] sm:$0xf0]  ;;  %s1844_s17 = sshll.u32 %s2585_s16, 4  ;;  %s1845_s17 = int_to_ptr.vmem [resolvable:$true] %s1844_s17 }
  0x1c   :  { %244 = vmatpush.bf16.msrb.mxu3 %v1888_v33  ;;  %459 = vmatpush.bf16.msrb.mxu0 %v2643_v42  ;;  %v2299_v4 = vld [vmem:[#allocation2 + $0xec] sm:$0xf]  ;;  %v2013_v5 = vld [vmem:[#allocation2 + $0xf8] sm:$0xf0]  ;;  %v2290_v6 = vld [vmem:[#allocation2 + $0xa4] sm:$0xf]  ;;  %v2682_v11 = vor.u32 %v2292_v3, %v1971_v63 }
  0x1d   :  { %472 = vmatpush.bf16.msrb.mxu1 %v2645_v43  ;;  %v1973_v7 = vld [vmem:[#allocation2 + $0xb0] sm:$0xf0]  ;;  %v1995_v8 = vld [vmem:[#allocation2 + $0xc8] sm:$0xf]  ;;  %v2676_v9 = vor.u32 %v2299_v4, %v2013_v5  ;;  %v2297_v10 = vld [vmem:[#allocation2 + $0xd4] sm:$0xf0] }
  0x1e   :  { %v2684_v12 = vor.u32 %v2290_v6, %v1973_v7  ;;  %v1955_v13 = vld [vmem:[#allocation2 + $0x80] sm:$0xf]  ;;  %v2288_v16 = vld [vmem:[#allocation2 + $0x8c] sm:$0xf0]  ;;  %v2286_v17 = vld [vmem:[#allocation2 + $0x84] sm:$0xf]  ;;  %v2686_v19 = vor.u32 %v2297_v10, %v1995_v8 }
  0x1f   :  { %484 = vmatpush.bf16.msra.mxu2 %v2635_v38  ;;  %v1957_v18 = vld [vmem:[#allocation2 + $0x90] sm:$0xf0]  ;;  %v1939_v20 = vld [vmem:[#allocation2 + $0x60] sm:$0xf]  ;;  %v1979_v21 = vld [vmem:[#allocation2 + $0xa8] sm:$0xf]  ;;  %v2698_v24 = vor.u32 %v2288_v16, %v1955_v13 }
  0x20   :  { %497 = vmatpush.bf16.msra.mxu3 %v2647_v49  ;;  %460 = vmatpush.bf16.msrb.mxu0 %v2655_v53  ;;  %v2293_v22 = vld [vmem:[#allocation2 + $0xb4] sm:$0xf0]  ;;  %v2295_v23 = vld [vmem:[#allocation2 + $0xcc] sm:$0xf]  ;;  %v2700_v25 = vor.u32 %v2286_v17, %v1957_v18  ;;  %v2284_v26 = vld [vmem:[#allocation2 + $0x6c] sm:$0xf0] }
  0x21   :  { %473 = vmatpush.bf16.msrb.mxu1 %v2657_v54  ;;  %v2282_v27 = vld [vmem:[#allocation2 + $0x64] sm:$0xf]  ;;  %v1997_v28 = vld [vmem:[#allocation2 + $0xd8] sm:$0xf0]  ;;  %v1941_v30 = vld [vmem:[#allocation2 + $0x70] sm:$0xf0]  ;;  %v2703_v31 = vor.u32 %v2293_v22, %v1979_v21  ;;  %v2712_v39 = vor.u32 %v2284_v26, %v1939_v20 }
  0x22   :  { %v2291_v32 = vld [vmem:[#allocation2 + $0xac] sm:$0xf]  ;;  %v1981_v33 = vld [vmem:[#allocation2 + $0xb8] sm:$0xf0]  ;;  %v1963_v35 = vld [vmem:[#allocation2 + $0x88] sm:$0xf]  ;;  %v2714_v40 = vor.u32 %v2282_v27, %v1941_v30 }
  0x23   :  { %485 = vmatpush.bf16.msra.mxu2 %v2650_v50  ;;  %v2289_v36 = vld [vmem:[#allocation2 + $0x94] sm:$0xf0]  ;;  %v2708_v37 = vor.u32 %v2291_v32, %v1981_v33  ;;  %v1923_v41 = vld [vmem:[#allocation2 + $0x40] sm:$0xf]  ;;  %v2280_v44 = vld [vmem:[#allocation2 + $0x4c] sm:$0xf0] }
  0x24   :  { %498 = vmatpush.bf16.msra.mxu3 %v2659_v61  ;;  %461 = vmatpush.bf16.msrb.mxu0 %v2672_v1  ;;  %v2278_v45 = vld [vmem:[#allocation2 + $0x44] sm:$0xf]  ;;  %v1925_v46 = vld [vmem:[#allocation2 + $0x50] sm:$0xf0]  ;;  %v2717_v47 = vor.u32 %v2289_v36, %v1963_v35  ;;  %v2722_v48 = vor.u32 %v2280_v44, %v1923_v41  ;;  %v1947_v55 = vld [vmem:[#allocation2 + $0x68] sm:$0xf] }
  0x25   :  { %474 = vmatpush.bf16.msrb.mxu1 %v2674_v2  ;;  %v2724_v51 = vor.u32 %v2278_v45, %v1925_v46  ;;  %v2268_v52 = vld [vmem:[%s3156_s0 + $0x10] sm:$0xff]  ;;  %v2285_v56 = vld [vmem:[#allocation2 + $0x74] sm:$0xf0]  ;;  %v2287_v57 = vld [vmem:[#allocation2 + $0x8c] sm:$0xf]  ;;  %v2584_v13 = vmov 0  }
  0x26   :  { %1906 = vmatmul.msk.bf16.gmra.mxu0 %vm137_vm0, %v2668_v0  ;;  %1913 = vmatmul.msk.bf16.vlgmr.msrb.gmra.mxu2 %vm137_vm0, %v2620_v14  ;;  %v2740_v58 = vor.u32 %v2285_v56, %v1947_v55  ;;  %v1965_v59 = vld [vmem:[#allocation2 + $0x98] sm:$0xf0]  ;;  %v1931_v60 = vld [vmem:[#allocation2 + $0x48] sm:$0xf]  ;;  %v2281_v63 = vld [vmem:[#allocation2 + $0x54] sm:$0xf0] }
  0x27   :  { %486 = vmatpush.bf16.msra.mxu2 %v2662_v62  ;;  %1910 = vmatmul.msk.bf16.gmra.mxu1 %vm137_vm0, %v2668_v0  ;;  %v2742_v3 = vor.u32 %v2287_v57, %v1965_v59  ;;  %v2283_v4 = vld [vmem:[#allocation2 + $0x6c] sm:$0xf]  ;;  %v1949_v5 = vld [vmem:[#allocation2 + $0x78] sm:$0xf0]  ;;  %v2747_v6 = vor.u32 %v2281_v63, %v1931_v60  ;;  %s1846_s20 = sshll.u32 %s3160_s4, 4  ;;  %s1847_s20 = int_to_ptr.hbm [resolvable:$true] %s1846_s20 }
  0x28   :  { %499 = vmatpush.bf16.msra.mxu3 %v2676_v9  ;;  %462 = vmatpush.bf16.msrb.mxu0 %v2682_v11  ;;  %v2279_v7 = vld [vmem:[#allocation2 + $0x4c] sm:$0xf]  ;;  %v1933_v8 = vld [vmem:[#allocation2 + $0x58] sm:$0xf0] }
  0x29   :  { %1917 = vmatmul.msk.bf16.vlgmr.msrb.gmra.mxu3 %vm137_vm0, %v2620_v14  ;;  %475 = vmatpush.bf16.msrb.mxu1 %v2684_v12  ;;  %v2705_v14 = vor.u32 %v2295_v23, %v1997_v28  ;;  %v2756_v10 = vor.u32 %v2279_v7, %v1933_v8 }
  0x2b   :  { %487 = vmatpush.bf16.msra.mxu2 %v2686_v19 }
  0x2c   :  { %500 = vmatpush.bf16.msra.mxu3 %v2705_v14  ;;  %463 = vmatpush.bf16.msrb.mxu0 %v2698_v24 }
  0x2d   :  { %476 = vmatpush.bf16.msrb.mxu1 %v2700_v25 }
  0x2f   :  { %488 = vmatpush.bf16.msra.mxu2 %v2703_v31 }
  0x30   :  { %501 = vmatpush.bf16.msra.mxu3 %v2708_v37  ;;  %464 = vmatpush.bf16.msrb.mxu0 %v2712_v39 }
  0x31   :  { %477 = vmatpush.bf16.msrb.mxu1 %v2714_v40 }
  0x33   :  { %489 = vmatpush.bf16.msra.mxu2 %v2717_v47 }
  0x34   :  { %465 = vmatpush.bf16.msrb.mxu0 %v2722_v48  ;;  %502 = vmatpush.bf16.msra.mxu3 %v2742_v3 }
  0x35   :  { %478 = vmatpush.bf16.msrb.mxu1 %v2724_v51 }
  0x36   :  { %1907 = vmatmul.msk.bf16.gmra.mxu0 %vm137_vm0, %v2268_v52  ;;  %1914 = vmatmul.msk.bf16.gmra.mxu2 %vm137_vm0, %v2668_v0 }
  0x37   :  { %1911 = vmatmul.msk.bf16.gmra.mxu1 %vm137_vm0, %v2268_v52  ;;  %490 = vmatpush.bf16.msra.mxu2 %v2740_v58 }
  0x38   :  { %578 = vmatpush.bf16.msra.mxu0 %v2627_v29 }
  0x39   :  { %591 = vmatpush.bf16.msra.mxu1 %v2629_v34  ;;  %1918 = vmatmul.msk.bf16.gmra.mxu3 %vm137_vm0, %v2668_v0  ;;  %v2750_v0 = vor.u32 %v2283_v4, %v1949_v5 }
  0x3b   :  { %491 = vmatpush.bf16.msra.mxu2 %v2747_v6  ;;  %503 = vmatpush.bf16.msra.mxu3 %v2750_v0 }
  0x3c   :  { %579 = vmatpush.bf16.msra.mxu0 %v2643_v42 }
  0x3d   :  { %592 = vmatpush.bf16.msra.mxu1 %v2645_v43 }
  0x3f   :  { %604 = vmatpush.bf16.msrb.mxu2 %v2635_v38  ;;  %504 = vmatpush.bf16.msra.mxu3 %v2756_v10 }
  0x40   :  { %580 = vmatpush.bf16.msra.mxu0 %v2655_v53 }
  0x41   :  { %593 = vmatpush.bf16.msra.mxu1 %v2657_v54 }
  0x43   :  { %605 = vmatpush.bf16.msrb.mxu2 %v2650_v50  ;;  %617 = vmatpush.bf16.msrb.mxu3 %v2647_v49 }
  0x44   :  { %581 = vmatpush.bf16.msra.mxu0 %v2672_v1 }
  0x45   :  { %594 = vmatpush.bf16.msra.mxu1 %v2674_v2 }
  0x46   :  { %1915 = vmatmul.msk.bf16.gmra.mxu2 %vm137_vm0, %v2268_v52  ;;  %466 = vmatmul.bf16.vlgmr.msrb.gmra.mxu0 %v2584_v13 }
  0x47   :  { %479 = vmatmul.bf16.vlgmr.msrb.gmra.mxu1 %v2584_v13  ;;  %618 = vmatpush.bf16.msrb.mxu3 %v2659_v61 }
  0x48   :  { %582 = vmatpush.bf16.msra.mxu0 %v2682_v11  ;;  %606 = vmatpush.bf16.msrb.mxu2 %v2662_v62 }
  0x49   :  { %595 = vmatpush.bf16.msra.mxu1 %v2684_v12  ;;  %1919 = vmatmul.msk.bf16.gmra.mxu3 %vm137_vm0, %v2268_v52 }
  0x4b   :  { %619 = vmatpush.bf16.msrb.mxu3 %v2676_v9 }
  0x4c   :  { %583 = vmatpush.bf16.msra.mxu0 %v2698_v24  ;;  %607 = vmatpush.bf16.msrb.mxu2 %v2686_v19 }
  0x4d   :  { %596 = vmatpush.bf16.msra.mxu1 %v2700_v25 }
  0x4f   :  { %620 = vmatpush.bf16.msrb.mxu3 %v2705_v14 }
  0x50   :  { %584 = vmatpush.bf16.msra.mxu0 %v2712_v39  ;;  %608 = vmatpush.bf16.msrb.mxu2 %v2703_v31 }
  0x51   :  { %597 = vmatpush.bf16.msra.mxu1 %v2714_v40 }
  0x53   :  { %621 = vmatpush.bf16.msrb.mxu3 %v2708_v37 }
  0x54   :  { %585 = vmatpush.bf16.msra.mxu0 %v2722_v48  ;;  %609 = vmatpush.bf16.msrb.mxu2 %v2717_v47 }
  0x55   :  { %598 = vmatpush.bf16.msra.mxu1 %v2724_v51 }
  0x56   :  { %1916 = vmatmul.msk.bf16.gmra.mxu2 %vm137_vm0, %v2625_v15 }
  0x57   :  { %622 = vmatpush.bf16.msrb.mxu3 %v2742_v3 }
  0x58   :  { %698 = vmatpush.bf16.msrb.mxu0 %v2627_v29  ;;  %610 = vmatpush.bf16.msrb.mxu2 %v2740_v58 }
  0x59   :  { %711 = vmatpush.bf16.msrb.mxu1 %v2629_v34  ;;  %1920 = vmatmul.msk.bf16.gmra.mxu3 %vm137_vm0, %v2625_v15  ;;  %v67_v15 = vld [vmem:[%s3159_s3] ss:$4 sm:$0xf] }
  0x5a   :  { %v2826_v18 = vperm.slane %v67_v15, 0  ;;  %v2828_v20 = vperm.slane %v67_v15, 1  ;;  %v2870_v7 = vperm.slane %v67_v15, 2  ;;  %v2872_v8 = vperm.slane %v67_v15, 3 }
  0x5b   :  { %623 = vmatpush.bf16.msrb.mxu3 %v2750_v0 }
  0x5c   :  { %699 = vmatpush.bf16.msrb.mxu0 %v2643_v42  ;;  %611 = vmatpush.bf16.msrb.mxu2 %v2747_v6 }
  0x5d   :  { %712 = vmatpush.bf16.msrb.mxu1 %v2645_v43 }
  0x5f   :  { %624 = vmatpush.bf16.msrb.mxu3 %v2756_v10 }
  0x60   :  { %700 = vmatpush.bf16.msrb.mxu0 %v2655_v53 }
  0x61   :  { %713 = vmatpush.bf16.msrb.mxu1 %v2657_v54 }
  0x64   :  { %701 = vmatpush.bf16.msrb.mxu0 %v2672_v1 }
  0x65   :  { %714 = vmatpush.bf16.msrb.mxu1 %v2674_v2 }
  0x66   :  { %492 = vmatmul.bf16.vlgmr.msra.gmra.mxu2 %v2584_v13 }
  0x67   :  { %724 = vmatpush.bf16.msra.mxu2 %v2635_v38 }
  0x68   :  { %702 = vmatpush.bf16.msrb.mxu0 %v2682_v11 }
  0x69   :  { %715 = vmatpush.bf16.msrb.mxu1 %v2684_v12  ;;  %505 = vmatmul.bf16.vlgmr.msra.gmra.mxu3 %v2584_v13 }
  0x6a   :  { %737 = vmatpush.bf16.msra.mxu3 %v2647_v49 }
  0x6b   :  { %725 = vmatpush.bf16.msra.mxu2 %v2650_v50 }
  0x6c   :  { %703 = vmatpush.bf16.msrb.mxu0 %v2698_v24 }
  0x6d   :  { %716 = vmatpush.bf16.msrb.mxu1 %v2700_v25 }
  0x6e   :  { %738 = vmatpush.bf16.msra.mxu3 %v2659_v61 }
  0x6f   :  { %726 = vmatpush.bf16.msra.mxu2 %v2662_v62 }
  0x70   :  { %704 = vmatpush.bf16.msrb.mxu0 %v2712_v39 }
  0x71   :  { %717 = vmatpush.bf16.msrb.mxu1 %v2714_v40 }
  0x72   :  { %739 = vmatpush.bf16.msra.mxu3 %v2676_v9 }
  0x73   :  { %727 = vmatpush.bf16.msra.mxu2 %v2686_v19 }
  0x74   :  { %705 = vmatpush.bf16.msrb.mxu0 %v2722_v48 }
  0x75   :  { %718 = vmatpush.bf16.msrb.mxu1 %v2724_v51 }
  0x76   :  { %740 = vmatpush.bf16.msra.mxu3 %v2705_v14 }
  0x77   :  { %728 = vmatpush.bf16.msra.mxu2 %v2703_v31 }
  0x7a   :  { %741 = vmatpush.bf16.msra.mxu3 %v2708_v37 }
  0x7b   :  { %729 = vmatpush.bf16.msra.mxu2 %v2717_v47 }
  0x7e   :  { %742 = vmatpush.bf16.msra.mxu3 %v2742_v3 }
  0x7f   :  { %730 = vmatpush.bf16.msra.mxu2 %v2740_v58 }
  0x82   :  { %743 = vmatpush.bf16.msra.mxu3 %v2750_v0 }
  0x83   :  { %731 = vmatpush.bf16.msra.mxu2 %v2747_v6 }
  0x86   :  { %744 = vmatpush.bf16.msra.mxu3 %v2756_v10 }
  0x93   :  { %v159_v16 = vpop.f32.mrf.mxu0 }
  0x94   :  { %v188_v17 = vpop.f32.mrf.mxu1  ;;  %v160_v15 = vadd.f32 %v159_v16, %v2826_v18 }
  0x99   :  { %v174_v21 = vpop.f32.mrf.mxu2 }
  0x9a   :  { %v2831_v22 = vadd.f32 %v174_v21, %v2826_v18 }
  0x9b   :  { %v2836_v27 = vpop.f32.mrf.mxu0 }
  0x9c   :  { %3161 = vst [vmem:[#allocation11_spill] sm:$0xff] %v2831_v22  ;;  %v203_v23 = vpop.f32.mrf.mxu3  ;;  %v2838_v28 = vpop.f32.mrf.mxu1 }
  0x9d   :  { %v2834_v26 = vadd.f32 %v203_v23, %v2828_v20 }
  0x9f   :  { %3162 = vst [vmem:[#allocation12_spill] sm:$0xff] %v2834_v26 }
  0xa1   :  { %v2840_v30 = vpop.f32.mrf.mxu2 }
  0xa2   :  { %3163 = vst [vmem:[#allocation13_spill] sm:$0xff] %v2840_v30  ;;  %v189_v30 = vadd.f32 %v188_v17, %v2828_v20 }
  0xa3   :  { %v164_v33 = vpop.f32.mrf.mxu0 }
  0xa4   :  { %v2842_v32 = vpop.f32.mrf.mxu3  ;;  %v2845_v35 = vadd.f32 %v164_v33, %v2826_v18  ;;  %v193_v36 = vpop.f32.mrf.mxu1 }
  0xa5   :  { %3164 = vst [vmem:[#allocation14_spill] sm:$0xff] %v2842_v32  ;;  %v2848_v41 = vadd.f32 %v193_v36, %v2828_v20 }
  0xa6   :  { %3165 = vst [vmem:[#allocation15_spill] sm:$0xff] %v2845_v35 }
  0xa7   :  { %3166 = vst [vmem:[#allocation16_spill] sm:$0xff] %v2848_v41 }
  0xa9   :  { %v2850_v44 = vpop.f32.mrf.mxu2 }
  0xab   :  { %v166_v46 = vpop.f32.mrf.mxu0 }
  0xac   :  { %v2852_v45 = vpop.f32.mrf.mxu3  ;;  %v2855_v52 = vadd.f32 %v166_v46, %v2826_v18  ;;  %v195_v55 = vpop.f32.mrf.mxu1 }
  0xad   :  { %v2858_v56 = vadd.f32 %v195_v55, %v2828_v20 }
  0xae   :  { %3167 = vst [vmem:[#allocation17_spill] sm:$0xff] %v2855_v52 }
  0xaf   :  { %3168 = vst [vmem:[#allocation18_spill] sm:$0xff] %v2858_v56 }
  0xb1   :  { %v2860_v57 = vpop.f32.mrf.mxu2 }
  0xb3   :  { %v169_v60 = vpop.f32.mrf.mxu0 }
  0xb4   :  { %v2862_v59 = vpop.f32.mrf.mxu3  ;;  %v2865_v63 = vadd.f32 %v169_v60, %v2826_v18  ;;  %v198_v4 = vpop.f32.mrf.mxu1 }
  0xb5   :  { %v2868_v5 = vadd.f32 %v198_v4, %v2828_v20 }
  0xb6   :  { %3169 = vst [vmem:[#allocation19_spill] sm:$0xff] %v2865_v63 }
  0xb7   :  { %3170 = vst [vmem:[#allocation20_spill] sm:$0xff] %v2868_v5 }
  0xb9   :  { %v222_v13 = vpop.f32.mrf.mxu2 }
  0xba   :  { %v2875_v21 = vadd.f32 %v222_v13, %v2870_v7 }
  0xbb   :  { %v171_v36 = vpop.f32.mrf.mxu0 }
  0xbc   :  { %3171 = vst [vmem:[#allocation21_spill] sm:$0xff] %v2875_v21  ;;  %v251_v23 = vpop.f32.mrf.mxu3  ;;  %v2881_v46 = vadd.f32 %v171_v36, %v2826_v18  ;;  %v200_v55 = vpop.f32.mrf.mxu1 }
  0xbd   :  { %v2878_v33 = vadd.f32 %v251_v23, %v2872_v8  ;;  %v2884_v60 = vadd.f32 %v200_v55, %v2828_v20 }
  0xbe   :  { %3173 = vst [vmem:[#allocation23_spill] sm:$0xff] %v2881_v46 }
  0xbf   :  { %3172 = vst [vmem:[#allocation22_spill] sm:$0xff] %v2878_v33 }
  0xc0   :  { %3174 = vst [vmem:[#allocation24_spill] sm:$0xff] %v2884_v60 }
  0xc1   :  { %v224_v4 = vpop.f32.mrf.mxu2 }
  0xc2   :  { %v2888_v32 = vadd.f32 %v224_v4, %v2870_v7 }
  0xc3   :  { %v467_v26 = vpop.f32.mrf.mxu0 }
  0xc4   :  { %3175 = vst [vmem:[#allocation25_spill] sm:$0xff] %v2888_v32  ;;  %v253_v13 = vpop.f32.mrf.mxu3  ;;  %v510_v22 = vadd.f32 %v467_v26, %v160_v15  ;;  %v480_v36 = vpop.f32.mrf.mxu1 }
  0xc5   :  { %v2892_v23 = vadd.f32 %v253_v13, %v2872_v8  ;;  %v511_v46 = vadd.f32 %v480_v36, %v189_v30 }
  0xc6   :  { %v2049_v5 = vmul.f32 -1.442695, %v510_v22 }
  0xc7   :  { %3176 = vst [vmem:[#allocation26_spill] sm:$0xff] %v2892_v23  ;;  %v2050_v63 = vmul.f32 -1.442695, %v511_v46 }
  0xc9   :  { %2372 = vpow2.f32 %v2050_v63  ;;  %v227_v55 = vpop.f32.mrf.mxu2 }
  0xca   :  { %2374 = vpow2.f32 %v2049_v5  ;;  %v2895_v16 = vadd.f32 %v227_v55, %v2870_v7 }
  0xcb   :  { %v469_v17 = vpop.f32.mrf.mxu0 }
  0xcc   :  { %3177 = vst [vmem:[#allocation27_spill] sm:$0xff] %v2895_v16  ;;  %v256_v4 = vpop.f32.mrf.mxu3  ;;  %v482_v32 = vpop.f32.mrf.mxu1 }
  0xcd   :  { %v2898_v60 = vadd.f32 %v256_v4, %v2872_v8 }
  0xcf   :  { %3178 = vst [vmem:[#allocation28_spill] sm:$0xff] %v2898_v60  ;;  %v2373_v13 = vpop.eup %2372 }
  0xd0   :  { %v2375_v23 = vpop.eup %2374  ;;  %v524_v56 = vadd.f32 1.0, %v2373_v13 }
  0xd1   :  { %v229_v26 = vpop.f32.mrf.mxu2  ;;  %v523_v63 = vadd.f32 1.0, %v2375_v23 }
  0xd2   :  { %v2901_v30 = vadd.f32 %v229_v26, %v2870_v7  ;;  %2376 = vrcp.f32 %v524_v56  ;;  %vm546_vm2 = vweird.f32 %v524_v56 }
  0xd3   :  { %2378 = vrcp.f32 %v523_v63  ;;  %vm531_vm5 = vweird.f32 %v523_v63 }
  0xd4   :  { %3179 = vst [vmem:[#allocation29_spill] sm:$0xff] %v2901_v30  ;;  %v258_v22 = vpop.f32.mrf.mxu3 }
  0xd5   :  { %v2904_v5 = vadd.f32 %v258_v22, %v2872_v8 }
  0xd7   :  { %3180 = vst [vmem:[#allocation30_spill] sm:$0xff] %v2904_v5 }
  0xd8   :  { %v2377_v32 = vpop.eup %2376 }
  0xd9   :  { %v232_v46 = vpop.f32.mrf.mxu2  ;;  %v2379_v4 = vpop.eup %2378  ;;  %v542_v17 = vmul.f32 %v2377_v32, %v524_v56  ;;  %vm547_vm1 = vweird.f32 %v2377_v32 }
  0xda   :  { %v2907_v15 = vadd.f32 %v232_v46, %v2870_v7  ;;  %v527_v13 = vmul.f32 %v2379_v4, %v523_v63  ;;  %vm532_vm3 = vweird.f32 %v2379_v4  ;;  %vm548_vm4 = vmor %vm546_vm2, %vm547_vm1 }
  0xdb   :  { %v543_v30 = vsub.f32 1.0, %v542_v17  ;;  %vm533_vm6 = vmor %vm531_vm5, %vm532_vm3 }
  0xdc   :  { %3181 = vst [vmem:[#allocation31_spill] sm:$0xff] %v2907_v15  ;;  %v261_v36 = vpop.f32.mrf.mxu3  ;;  %v528_v60 = vsub.f32 1.0, %v527_v13  ;;  %v218_v15 = vadd.f32 %v2850_v44, %v2870_v7  ;;  %v550_v13 = vand.u32 2147483647, %v524_v56  ;;  %v535_v44 = vand.u32 2147483647, %v523_v63 }
  0xdd   :  { %v2910_v55 = vadd.f32 %v261_v36, %v2872_v8  ;;  %v544_v46 = vmul.f32 %v2377_v32, %v543_v30  ;;  %v247_v36 = vadd.f32 %v2852_v45, %v2872_v8  ;;  %v537_v30 = vand.u32 2147483648, %v523_v63 }
  0xde   :  { %v529_v16 = vmul.f32 %v2379_v4, %v528_v60  ;;  %vm551_vm7 = vcmp.eq.f32.partialorder %v550_v13, 8.507059e+37  ;;  %vm536_vm8 = vcmp.eq.f32.partialorder %v535_v44, 8.507059e+37 }
  0xdf   :  { %3182 = vst [vmem:[#allocation32_spill] sm:$0xff] %v2910_v55  ;;  %v545_v17 = vadd.f32 %v2377_v32, %v544_v46 }
  0xe1   :  { %v234_v26 = vpop.f32.mrf.mxu2  ;;  %v549_v60 = vsel %vm548_vm4, %v2377_v32, %v545_v17 }
  0xe2   :  { %v2913_v23 = vadd.f32 %v234_v26, %v2870_v7  ;;  %v552_v26 = vand.u32 2147483648, %v524_v56 }
  0xe4   :  { %3183 = vst [vmem:[#allocation33_spill] sm:$0xff] %v2913_v23  ;;  %v263_v22 = vpop.f32.mrf.mxu3  ;;  %v553_v45 = vor.u32 1.1754944e-38, %v552_v26 }
  0xe5   :  { %v2916_v5 = vadd.f32 %v263_v22, %v2872_v8  ;;  %v530_v22 = vadd.f32 %v2379_v4, %v529_v16 }
  0xe6   :  { %v554_v46 = vsel %vm551_vm7, %v553_v45, %v549_v60  ;;  %v191_v45 = vadd.f32 %v2838_v28, %v2828_v20 }
  0xe7   :  { %3184 = vst [vmem:[#allocation34_spill] sm:$0xff] %v2916_v5  ;;  %v572_v56 = vmul.f32 0.0, %v554_v46 }
  0xe9   :  { %v493_v55 = vpop.f32.mrf.mxu2 }
  0xea   :  { %v512_v52 = vadd.f32 %v493_v55, %v218_v15  ;;  %v534_v15 = vsel %vm533_vm6, %v2379_v4, %v530_v22  ;;  %v538_v55 = vor.u32 1.1754944e-38, %v537_v30 }
  0xec   :  { %v506_v33 = vpop.f32.mrf.mxu3  ;;  %v2051_v21 = vmul.f32 -1.442695, %v512_v52  ;;  %v539_v16 = vsel %vm536_vm8, %v538_v55, %v534_v15 }
  0xed   :  { %v513_v23 = vadd.f32 %v506_v33, %v247_v36 }
  0xef   :  { %2380 = vtanh.f32 %v513_v23 }
  0xf0   :  { %2382 = vpow2.f32 %v2051_v21 }
  0xf1   :  { %v495_v5 = vpop.f32.mrf.mxu2 }
  0xf4   :  { %v508_v33 = vpop.f32.mrf.mxu3 }
  0xf5   :  { %v2381_v52 = vpop.eup %2380 }
  0xf6   :  { %v2383_v36 = vpop.eup %2382  ;;  %v573_v41 = vmul.f32 %v2381_v52, %v539_v16 }
  0xf7   :  { %v525_v35 = vadd.f32 1.0, %v2383_v36  ;;  %v220_v36 = vadd.f32 %v2860_v57, %v2870_v7  ;;  %v249_v57 = vadd.f32 %v2862_v59, %v2872_v8 }
  0xf8   :  { %v2922_v23 = vadd.f32 %v573_v41, %v572_v56 }
  0xf9   :  { %2384 = vrcp.f32 %v525_v35  ;;  %v567_v4 = vand.u32 2147483648, %v525_v35  ;;  %v565_v5 = vand.u32 2147483647, %v525_v35  ;;  %vm561_vm10 = vweird.f32 %v525_v35 }
  0xfa   :  { %2386 = vtanh.f32 %v2922_v23 }
  0xfb   :  { %v568_v22 = vor.u32 1.1754944e-38, %v567_v4  ;;  %vm566_vm12 = vcmp.eq.f32.partialorder %v565_v5, 8.507059e+37 }
  0xff   :  { %v2385_v21 = vpop.eup %2384 }
 0x100   :  { %v557_v63 = vmul.f32 %v2385_v21, %v525_v35  ;;  %vm562_vm9 = vweird.f32 %v2385_v21  ;;  %v2387_v30 = vpop.eup %2386  ;;  %v162_v35 = vadd.f32 %v2836_v27, %v2826_v18 }
 0x101   :  { %vm563_vm11 = vmor %vm561_vm10, %vm562_vm9 }
 0x102   :  { %v558_v32 = vsub.f32 1.0, %v557_v63 }
 0x104   :  { %v559_v17 = vmul.f32 %v2385_v21, %v558_v32 }
 0x106   :  { %v560_v26 = vadd.f32 %v2385_v21, %v559_v17 }
 0x108   :  { %v564_v13 = vsel %vm563_vm11, %v2385_v21, %v560_v26 }
 0x109   :  { %v569_v44 = vsel %vm566_vm12, %v568_v22, %v564_v13 }
 0x10a   :  { %v576_v41 = vmul.f32 %v2387_v30, %v569_v44 }
 0x10c   :  { %v577_v60 = vpack.c.bf16 %v576_v41, %v576_v41 }
 0x10e   :  { %586 = vmatmul.bf16.vlgmr.msra.gmra.mxu0 %v577_v60  ;;  %599 = vmatmul.bf16.vlgmr.msra.gmra.mxu1 %v577_v60 }
 0x10f   :  { %612 = vmatmul.bf16.vlgmr.msrb.gmra.mxu2 %v577_v60  ;;  %625 = vmatmul.bf16.vlgmr.msrb.gmra.mxu3 %v577_v60 }
 0x110   :  { %818 = vmatpush.bf16.msra.mxu0 %v2627_v29  ;;  %831 = vmatpush.bf16.msra.mxu1 %v2629_v34 }
 0x111   :  { %844 = vmatpush.bf16.msrb.mxu2 %v2635_v38  ;;  %857 = vmatpush.bf16.msrb.mxu3 %v2647_v49 }
 0x114   :  { %819 = vmatpush.bf16.msra.mxu0 %v2643_v42  ;;  %832 = vmatpush.bf16.msra.mxu1 %v2645_v43 }
 0x115   :  { %845 = vmatpush.bf16.msrb.mxu2 %v2650_v50  ;;  %858 = vmatpush.bf16.msrb.mxu3 %v2659_v61 }
 0x118   :  { %820 = vmatpush.bf16.msra.mxu0 %v2655_v53  ;;  %833 = vmatpush.bf16.msra.mxu1 %v2657_v54 }
 0x119   :  { %846 = vmatpush.bf16.msrb.mxu2 %v2662_v62  ;;  %859 = vmatpush.bf16.msrb.mxu3 %v2676_v9 }
 0x11c   :  { %821 = vmatpush.bf16.msra.mxu0 %v2672_v1  ;;  %834 = vmatpush.bf16.msra.mxu1 %v2674_v2 }
 0x11d   :  { %847 = vmatpush.bf16.msrb.mxu2 %v2686_v19  ;;  %860 = vmatpush.bf16.msrb.mxu3 %v2705_v14 }
 0x120   :  { %822 = vmatpush.bf16.msra.mxu0 %v2682_v11  ;;  %835 = vmatpush.bf16.msra.mxu1 %v2684_v12 }
 0x121   :  { %848 = vmatpush.bf16.msrb.mxu2 %v2703_v31  ;;  %861 = vmatpush.bf16.msrb.mxu3 %v2708_v37 }
 0x124   :  { %823 = vmatpush.bf16.msra.mxu0 %v2698_v24  ;;  %836 = vmatpush.bf16.msra.mxu1 %v2700_v25 }
 0x125   :  { %849 = vmatpush.bf16.msrb.mxu2 %v2717_v47  ;;  %862 = vmatpush.bf16.msrb.mxu3 %v2742_v3 }
 0x128   :  { %824 = vmatpush.bf16.msra.mxu0 %v2712_v39  ;;  %837 = vmatpush.bf16.msra.mxu1 %v2714_v40 }
 0x129   :  { %850 = vmatpush.bf16.msrb.mxu2 %v2740_v58  ;;  %863 = vmatpush.bf16.msrb.mxu3 %v2750_v0 }
 0x12c   :  { %825 = vmatpush.bf16.msra.mxu0 %v2722_v48  ;;  %838 = vmatpush.bf16.msra.mxu1 %v2724_v51 }
 0x12d   :  { %851 = vmatpush.bf16.msrb.mxu2 %v2747_v6  ;;  %864 = vmatpush.bf16.msrb.mxu3 %v2756_v10 }
 0x18b   :  { %v587_v15 = vpop.f32.mrf.mxu0  ;;  %v600_v55 = vpop.f32.mrf.mxu1 }
 0x18c   :  { %v630_v46 = vadd.f32 %v587_v15, %v162_v35  ;;  %v631_v33 = vadd.f32 %v600_v55, %v191_v45 }
 0x18e   :  { %v2052_v52 = vmul.f32 -1.442695, %v630_v46  ;;  %v2053_v16 = vmul.f32 -1.442695, %v631_v33 }
 0x190   :  { %2388 = vpow2.f32 %v2052_v52 }
 0x191   :  { %2390 = vpow2.f32 %v2053_v16 }
 0x192   :  { %v613_v56 = vpop.f32.mrf.mxu2  ;;  %v626_v21 = vpop.f32.mrf.mxu3 }
 0x193   :  { %v632_v63 = vadd.f32 %v613_v56, %v220_v36  ;;  %v589_v32 = vpop.f32.mrf.mxu0  ;;  %v602_v4 = vpop.f32.mrf.mxu1  ;;  %v633_v41 = vadd.f32 %v626_v21, %v249_v57 }
 0x195   :  { %v2054_v27 = vmul.f32 -1.442695, %v632_v63 }
 0x196   :  { %v2389_v17 = vpop.eup %2388 }
 0x197   :  { %v2391_v5 = vpop.eup %2390  ;;  %v643_v28 = vadd.f32 1.0, %v2389_v17  ;;  %2392 = vpow2.f32 %v2054_v27 }
 0x198   :  { %v644_v26 = vadd.f32 1.0, %v2391_v5 }
 0x199   :  { %2394 = vrcp.f32 %v643_v28  ;;  %v657_v46 = vand.u32 2147483648, %v643_v28  ;;  %v655_v16 = vand.u32 2147483647, %v643_v28  ;;  %vm651_vm15 = vweird.f32 %v643_v28 }
 0x19a   :  { %2396 = vrcp.f32 %v644_v26  ;;  %v615_v22 = vpop.f32.mrf.mxu2  ;;  %v628_v13 = vpop.f32.mrf.mxu3  ;;  %v672_v33 = vand.u32 2147483648, %v644_v26  ;;  %v670_v56 = vand.u32 2147483647, %v644_v26  ;;  %vm666_vm0 = vweird.f32 %v644_v26 }
 0x19b   :  { %v658_v21 = vor.u32 1.1754944e-38, %v657_v46  ;;  %vm656_vm3 = vcmp.eq.f32.partialorder %v655_v16, 8.507059e+37  ;;  %v3185_v16 = vld [vmem:[#allocation15_spill] sm:$0xff] }
 0x19c   :  { %v673_v4 = vor.u32 1.1754944e-38, %v672_v33  ;;  %vm671_vm4 = vcmp.eq.f32.partialorder %v670_v56, 8.507059e+37  ;;  %v3186_v56 = vld [vmem:[#allocation16_spill] sm:$0xff] }
 0x19d   :  { %v2393_v30 = vpop.eup %2392 }
 0x19e   :  { %v645_v7 = vadd.f32 1.0, %v2393_v30 }
 0x19f   :  { %v2395_v44 = vpop.eup %2394 }
 0x1a0   :  { %v2397_v60 = vpop.eup %2396  ;;  %v647_v35 = vmul.f32 %v2395_v44, %v643_v28  ;;  %2398 = vrcp.f32 %v645_v7  ;;  %vm652_vm13 = vweird.f32 %v2395_v44  ;;  %vm681_vm6 = vweird.f32 %v645_v7 }
 0x1a1   :  { %v662_v45 = vmul.f32 %v2397_v60, %v644_v26  ;;  %2400 = vtanh.f32 %v633_v41  ;;  %vm667_vm14 = vweird.f32 %v2397_v60  ;;  %vm653_vm1 = vmor %vm651_vm15, %vm652_vm13 }
 0x1a2   :  { %v648_v15 = vsub.f32 1.0, %v647_v35  ;;  %vm668_vm2 = vmor %vm666_vm0, %vm667_vm14 }
 0x1a3   :  { %v663_v55 = vsub.f32 1.0, %v662_v45  ;;  %v687_v45 = vand.u32 2147483648, %v645_v7 }
 0x1a4   :  { %v649_v52 = vmul.f32 %v2395_v44, %v648_v15 }
 0x1a5   :  { %v664_v36 = vmul.f32 %v2397_v60, %v663_v55  ;;  %v688_v55 = vor.u32 1.1754944e-38, %v687_v45 }
 0x1a6   :  { %v2399_v63 = vpop.eup %2398  ;;  %v650_v59 = vadd.f32 %v2395_v44, %v649_v52 }
 0x1a7   :  { %v677_v8 = vmul.f32 %v2399_v63, %v645_v7  ;;  %v665_v32 = vadd.f32 %v2397_v60, %v664_v36  ;;  %v2401_v17 = vpop.eup %2400  ;;  %vm682_vm5 = vweird.f32 %v2399_v63 }
 0x1a8   :  { %v654_v27 = vsel %vm653_vm1, %v2395_v44, %v650_v59  ;;  %v685_v44 = vand.u32 2147483647, %v645_v7  ;;  %vm683_vm7 = vmor %vm681_vm6, %vm682_vm5 }
 0x1a9   :  { %v678_v5 = vsub.f32 1.0, %v677_v8  ;;  %v659_v22 = vsel %vm656_vm3, %v658_v21, %v654_v27  ;;  %v669_v13 = vsel %vm668_vm2, %v2397_v60, %v665_v32 }
 0x1aa   :  { %v674_v30 = vsel %vm671_vm4, %v673_v4, %v669_v13  ;;  %v693_v57 = vmul.f32 %v2401_v17, %v659_v22  ;;  %vm686_vm8 = vcmp.eq.f32.partialorder %v685_v44, 8.507059e+37  ;;  %v3187_v4 = vld [vmem:[#allocation21_spill] sm:$0xff] }
 0x1ab   :  { %v692_v41 = vmul.f32 %v674_v30, %v2922_v23  ;;  %v679_v35 = vmul.f32 %v2399_v63, %v678_v5 }
 0x1ad   :  { %v2966_v28 = vadd.f32 %v693_v57, %v692_v41  ;;  %v680_v26 = vadd.f32 %v2399_v63, %v679_v35 }
 0x1af   :  { %2402 = vtanh.f32 %v2966_v28  ;;  %v684_v15 = vsel %vm683_vm7, %v2399_v63, %v680_v26 }
 0x1b0   :  { %v689_v46 = vsel %vm686_vm8, %v688_v55, %v684_v15  ;;  %v3188_v55 = vld [vmem:[#allocation22_spill] sm:$0xff] }
 0x1b5   :  { %v2403_v60 = vpop.eup %2402 }
 0x1b6   :  { %v696_v33 = vmul.f32 %v2403_v60, %v689_v46 }
 0x1b8   :  { %v697_v52 = vpack.c.bf16 %v696_v33, %v696_v33 }
 0x1ba   :  { %706 = vmatmul.bf16.vlgmr.msrb.gmra.mxu0 %v697_v52  ;;  %719 = vmatmul.bf16.vlgmr.msrb.gmra.mxu1 %v697_v52 }
 0x1bb   :  { %732 = vmatmul.bf16.vlgmr.msra.gmra.mxu2 %v697_v52  ;;  %745 = vmatmul.bf16.vlgmr.msra.gmra.mxu3 %v697_v52 }
 0x1bc   :  { %938 = vmatpush.bf16.msrb.mxu0 %v2627_v29  ;;  %951 = vmatpush.bf16.msrb.mxu1 %v2629_v34 }
 0x1bd   :  { %964 = vmatpush.bf16.msra.mxu2 %v2635_v38  ;;  %977 = vmatpush.bf16.msra.mxu3 %v2647_v49 }
 0x1c0   :  { %939 = vmatpush.bf16.msrb.mxu0 %v2643_v42  ;;  %952 = vmatpush.bf16.msrb.mxu1 %v2645_v43 }
 0x1c1   :  { %965 = vmatpush.bf16.msra.mxu2 %v2650_v50  ;;  %978 = vmatpush.bf16.msra.mxu3 %v2659_v61 }
 0x1c4   :  { %940 = vmatpush.bf16.msrb.mxu0 %v2655_v53  ;;  %953 = vmatpush.bf16.msrb.mxu1 %v2657_v54 }
 0x1c5   :  { %966 = vmatpush.bf16.msra.mxu2 %v2662_v62  ;;  %979 = vmatpush.bf16.msra.mxu3 %v2676_v9 }
 0x1c8   :  { %941 = vmatpush.bf16.msrb.mxu0 %v2672_v1  ;;  %954 = vmatpush.bf16.msrb.mxu1 %v2674_v2 }
 0x1c9   :  { %967 = vmatpush.bf16.msra.mxu2 %v2686_v19  ;;  %980 = vmatpush.bf16.msra.mxu3 %v2705_v14 }
 0x1cc   :  { %942 = vmatpush.bf16.msrb.mxu0 %v2682_v11  ;;  %955 = vmatpush.bf16.msrb.mxu1 %v2684_v12 }
 0x1cd   :  { %968 = vmatpush.bf16.msra.mxu2 %v2703_v31  ;;  %981 = vmatpush.bf16.msra.mxu3 %v2708_v37 }
 0x1d0   :  { %943 = vmatpush.bf16.msrb.mxu0 %v2698_v24  ;;  %956 = vmatpush.bf16.msrb.mxu1 %v2700_v25 }
 0x1d1   :  { %969 = vmatpush.bf16.msra.mxu2 %v2717_v47  ;;  %982 = vmatpush.bf16.msra.mxu3 %v2742_v3 }
 0x1d4   :  { %944 = vmatpush.bf16.msrb.mxu0 %v2712_v39  ;;  %957 = vmatpush.bf16.msrb.mxu1 %v2714_v40 }
 0x1d5   :  { %970 = vmatpush.bf16.msra.mxu2 %v2740_v58  ;;  %983 = vmatpush.bf16.msra.mxu3 %v2750_v0 }
 0x1d8   :  { %945 = vmatpush.bf16.msrb.mxu0 %v2722_v48  ;;  %958 = vmatpush.bf16.msrb.mxu1 %v2724_v51 }
 0x1d9   :  { %971 = vmatpush.bf16.msra.mxu2 %v2747_v6  ;;  %984 = vmatpush.bf16.msra.mxu3 %v2756_v10 }
 0x237   :  { %v707_v23 = vpop.f32.mrf.mxu0  ;;  %v720_v7 = vpop.f32.mrf.mxu1 }
 0x238   :  { %v750_v36 = vadd.f32 %v707_v23, %v3185_v16  ;;  %v751_v63 = vadd.f32 %v720_v7, %v3186_v56 }
 0x23a   :  { %v2055_v59 = vmul.f32 -1.442695, %v750_v36  ;;  %v2056_v8 = vmul.f32 -1.442695, %v751_v63 }
 0x23c   :  { %2404 = vpow2.f32 %v2055_v59 }
 0x23d   :  { %2406 = vpow2.f32 %v2056_v8 }
 0x23e   :  { %v733_v21 = vpop.f32.mrf.mxu2  ;;  %v746_v32 = vpop.f32.mrf.mxu3 }
 0x23f   :  { %v752_v27 = vadd.f32 %v733_v21, %v3187_v4  ;;  %v709_v17 = vpop.f32.mrf.mxu0  ;;  %v722_v5 = vpop.f32.mrf.mxu1  ;;  %v753_v60 = vadd.f32 %v746_v32, %v3188_v55 }
 0x241   :  { %v2057_v22 = vmul.f32 -1.442695, %v752_v27 }
 0x242   :  { %v2405_v13 = vpop.eup %2404 }
 0x243   :  { %v2407_v30 = vpop.eup %2406  ;;  %v763_v57 = vadd.f32 1.0, %v2405_v13  ;;  %2408 = vpow2.f32 %v2057_v22 }
 0x244   :  { %v764_v41 = vadd.f32 1.0, %v2407_v30 }
 0x245   :  { %2410 = vrcp.f32 %v763_v57  ;;  %v777_v16 = vand.u32 2147483648, %v763_v57  ;;  %v775_v63 = vand.u32 2147483647, %v763_v57  ;;  %vm771_vm11 = vweird.f32 %v763_v57 }
 0x246   :  { %2412 = vrcp.f32 %v764_v41  ;;  %v735_v35 = vpop.f32.mrf.mxu2  ;;  %v748_v26 = vpop.f32.mrf.mxu3  ;;  %v792_v36 = vand.u32 2147483648, %v764_v41  ;;  %v790_v8 = vand.u32 2147483647, %v764_v41  ;;  %vm786_vm12 = vweird.f32 %v764_v41 }
 0x247   :  { %v778_v27 = vor.u32 1.1754944e-38, %v777_v16  ;;  %vm776_vm15 = vcmp.eq.f32.partialorder %v775_v63, 8.507059e+37  ;;  %v3189_v63 = vld [vmem:[#allocation17_spill] sm:$0xff] }
 0x248   :  { %v793_v5 = vor.u32 1.1754944e-38, %v792_v36  ;;  %vm791_vm0 = vcmp.eq.f32.partialorder %v790_v8, 8.507059e+37  ;;  %v3190_v8 = vld [vmem:[#allocation18_spill] sm:$0xff] }
 0x249   :  { %v2409_v45 = vpop.eup %2408 }
 0x24a   :  { %v765_v44 = vadd.f32 1.0, %v2409_v45 }
 0x24b   :  { %v2411_v15 = vpop.eup %2410 }
 0x24c   :  { %v2413_v46 = vpop.eup %2412  ;;  %v767_v33 = vmul.f32 %v2411_v15, %v763_v57  ;;  %2414 = vrcp.f32 %v765_v44  ;;  %vm772_vm9 = vweird.f32 %v2411_v15  ;;  %vm801_vm2 = vweird.f32 %v765_v44 }
 0x24d   :  { %v782_v52 = vmul.f32 %v2413_v46, %v764_v41  ;;  %2416 = vtanh.f32 %v753_v60  ;;  %vm787_vm10 = vweird.f32 %v2413_v46  ;;  %vm773_vm13 = vmor %vm771_vm11, %vm772_vm9 }
 0x24e   :  { %v768_v23 = vsub.f32 1.0, %v767_v33  ;;  %vm788_vm14 = vmor %vm786_vm12, %vm787_vm10 }
 0x24f   :  { %v783_v7 = vsub.f32 1.0, %v782_v52  ;;  %v807_v52 = vand.u32 2147483648, %v765_v44 }
 0x250   :  { %v769_v56 = vmul.f32 %v2411_v15, %v768_v23 }
 0x251   :  { %v784_v59 = vmul.f32 %v2413_v46, %v783_v7  ;;  %v808_v7 = vor.u32 1.1754944e-38, %v807_v52 }
 0x252   :  { %v2415_v21 = vpop.eup %2414  ;;  %v770_v4 = vadd.f32 %v2411_v15, %v769_v56 }
 0x253   :  { %v797_v32 = vmul.f32 %v2415_v21, %v765_v44  ;;  %v785_v17 = vadd.f32 %v2413_v46, %v784_v59  ;;  %v2417_v13 = vpop.eup %2416  ;;  %vm802_vm1 = vweird.f32 %v2415_v21 }
 0x254   :  { %v774_v22 = vsel %vm773_vm13, %v2411_v15, %v770_v4  ;;  %v805_v15 = vand.u32 2147483647, %v765_v44  ;;  %vm803_vm3 = vmor %vm801_vm2, %vm802_vm1 }
 0x255   :  { %v798_v30 = vsub.f32 1.0, %v797_v32  ;;  %v779_v35 = vsel %vm776_vm15, %v778_v27, %v774_v22  ;;  %v789_v26 = vsel %vm788_vm14, %v2413_v46, %v785_v17 }
 0x256   :  { %v794_v45 = vsel %vm791_vm0, %v793_v5, %v789_v26  ;;  %v813_v55 = vmul.f32 %v2417_v13, %v779_v35  ;;  %vm806_vm4 = vcmp.eq.f32.partialorder %v805_v15, 8.507059e+37  ;;  %v3191_v5 = vld [vmem:[#allocation25_spill] sm:$0xff] }
 0x257   :  { %v812_v60 = vmul.f32 %v794_v45, %v2966_v28  ;;  %v799_v33 = vmul.f32 %v2415_v21, %v798_v30 }
 0x259   :  { %v3006_v57 = vadd.f32 %v813_v55, %v812_v60  ;;  %v800_v41 = vadd.f32 %v2415_v21, %v799_v33 }
 0x25b   :  { %2418 = vtanh.f32 %v3006_v57  ;;  %v804_v23 = vsel %vm803_vm3, %v2415_v21, %v800_v41 }
 0x25c   :  { %v809_v16 = vsel %vm806_vm4, %v808_v7, %v804_v23  ;;  %v3192_v7 = vld [vmem:[#allocation26_spill] sm:$0xff] }
 0x261   :  { %v2419_v46 = vpop.eup %2418 }
 0x262   :  { %v816_v36 = vmul.f32 %v2419_v46, %v809_v16 }
 0x264   :  { %v817_v56 = vpack.c.bf16 %v816_v36, %v816_v36 }
 0x266   :  { %826 = vmatmul.bf16.vlgmr.msra.gmra.mxu0 %v817_v56  ;;  %839 = vmatmul.bf16.vlgmr.msra.gmra.mxu1 %v817_v56 }
 0x267   :  { %852 = vmatmul.bf16.vlgmr.msrb.gmra.mxu2 %v817_v56  ;;  %865 = vmatmul.bf16.vlgmr.msrb.gmra.mxu3 %v817_v56 }
 0x268   :  { %1058 = vmatpush.bf16.msra.mxu0 %v2627_v29  ;;  %1071 = vmatpush.bf16.msra.mxu1 %v2629_v34 }
 0x269   :  { %1084 = vmatpush.bf16.msrb.mxu2 %v2635_v38  ;;  %1097 = vmatpush.bf16.msrb.mxu3 %v2647_v49 }
 0x26c   :  { %1059 = vmatpush.bf16.msra.mxu0 %v2643_v42  ;;  %1072 = vmatpush.bf16.msra.mxu1 %v2645_v43 }
 0x26d   :  { %1085 = vmatpush.bf16.msrb.mxu2 %v2650_v50  ;;  %1098 = vmatpush.bf16.msrb.mxu3 %v2659_v61 }
 0x270   :  { %1060 = vmatpush.bf16.msra.mxu0 %v2655_v53  ;;  %1073 = vmatpush.bf16.msra.mxu1 %v2657_v54 }
 0x271   :  { %1086 = vmatpush.bf16.msrb.mxu2 %v2662_v62  ;;  %1099 = vmatpush.bf16.msrb.mxu3 %v2676_v9 }
 0x274   :  { %1061 = vmatpush.bf16.msra.mxu0 %v2672_v1  ;;  %1074 = vmatpush.bf16.msra.mxu1 %v2674_v2 }
 0x275   :  { %1087 = vmatpush.bf16.msrb.mxu2 %v2686_v19  ;;  %1100 = vmatpush.bf16.msrb.mxu3 %v2705_v14 }
 0x278   :  { %1062 = vmatpush.bf16.msra.mxu0 %v2682_v11  ;;  %1075 = vmatpush.bf16.msra.mxu1 %v2684_v12 }
 0x279   :  { %1088 = vmatpush.bf16.msrb.mxu2 %v2703_v31  ;;  %1101 = vmatpush.bf16.msrb.mxu3 %v2708_v37 }
 0x27c   :  { %1063 = vmatpush.bf16.msra.mxu0 %v2698_v24  ;;  %1076 = vmatpush.bf16.msra.mxu1 %v2700_v25 }
 0x27d   :  { %1089 = vmatpush.bf16.msrb.mxu2 %v2717_v47  ;;  %1102 = vmatpush.bf16.msrb.mxu3 %v2742_v3 }
 0x280   :  { %1064 = vmatpush.bf16.msra.mxu0 %v2712_v39  ;;  %1077 = vmatpush.bf16.msra.mxu1 %v2714_v40 }
 0x281   :  { %1090 = vmatpush.bf16.msrb.mxu2 %v2740_v58  ;;  %1103 = vmatpush.bf16.msrb.mxu3 %v2750_v0 }
 0x284   :  { %1065 = vmatpush.bf16.msra.mxu0 %v2722_v48  ;;  %1078 = vmatpush.bf16.msra.mxu1 %v2724_v51 }
 0x285   :  { %1091 = vmatpush.bf16.msrb.mxu2 %v2747_v6  ;;  %1104 = vmatpush.bf16.msrb.mxu3 %v2756_v10 }
 0x2e3   :  { %v827_v28 = vpop.f32.mrf.mxu0  ;;  %v840_v44 = vpop.f32.mrf.mxu1 }
 0x2e4   :  { %v870_v59 = vadd.f32 %v827_v28, %v3189_v63  ;;  %v871_v21 = vadd.f32 %v840_v44, %v3190_v8 }
 0x2e6   :  { %v2058_v4 = vmul.f32 -1.442695, %v870_v59  ;;  %v2059_v32 = vmul.f32 -1.442695, %v871_v21 }
 0x2e8   :  { %2420 = vpow2.f32 %v2058_v4 }
 0x2e9   :  { %2422 = vpow2.f32 %v2059_v32 }
 0x2ea   :  { %v853_v27 = vpop.f32.mrf.mxu2  ;;  %v866_v17 = vpop.f32.mrf.mxu3 }
 0x2eb   :  { %v872_v22 = vadd.f32 %v853_v27, %v3191_v5  ;;  %v829_v13 = vpop.f32.mrf.mxu0  ;;  %v842_v30 = vpop.f32.mrf.mxu1  ;;  %v873_v46 = vadd.f32 %v866_v17, %v3192_v7 }
 0x2ed   :  { %v2060_v35 = vmul.f32 -1.442695, %v872_v22 }
 0x2ee   :  { %v2421_v26 = vpop.eup %2420 }
 0x2ef   :  { %v2423_v45 = vpop.eup %2422  ;;  %v883_v55 = vadd.f32 1.0, %v2421_v26  ;;  %2424 = vpow2.f32 %v2060_v35 }
 0x2f0   :  { %v884_v60 = vadd.f32 1.0, %v2423_v45 }
 0x2f1   :  { %2426 = vrcp.f32 %v883_v55  ;;  %v897_v63 = vand.u32 2147483648, %v883_v55  ;;  %v895_v21 = vand.u32 2147483647, %v883_v55  ;;  %vm891_vm7 = vweird.f32 %v883_v55 }
 0x2f2   :  { %2428 = vrcp.f32 %v884_v60  ;;  %v855_v33 = vpop.f32.mrf.mxu2  ;;  %v868_v41 = vpop.f32.mrf.mxu3  ;;  %v912_v59 = vand.u32 2147483648, %v884_v60  ;;  %v910_v32 = vand.u32 2147483647, %v884_v60  ;;  %vm906_vm8 = vweird.f32 %v884_v60 }
 0x2f3   :  { %v898_v22 = vor.u32 1.1754944e-38, %v897_v63  ;;  %vm896_vm11 = vcmp.eq.f32.partialorder %v895_v21, 8.507059e+37  ;;  %v3193_v21 = vld [vmem:[#allocation19_spill] sm:$0xff] }
 0x2f4   :  { %v913_v30 = vor.u32 1.1754944e-38, %v912_v59  ;;  %vm911_vm12 = vcmp.eq.f32.partialorder %v910_v32, 8.507059e+37  ;;  %v3194_v32 = vld [vmem:[#allocation20_spill] sm:$0xff] }
 0x2f5   :  { %v2425_v52 = vpop.eup %2424 }
 0x2f6   :  { %v885_v15 = vadd.f32 1.0, %v2425_v52 }
 0x2f7   :  { %v2427_v23 = vpop.eup %2426 }
 0x2f8   :  { %v2429_v16 = vpop.eup %2428  ;;  %v887_v36 = vmul.f32 %v2427_v23, %v883_v55  ;;  %2430 = vrcp.f32 %v885_v15  ;;  %vm892_vm5 = vweird.f32 %v2427_v23  ;;  %vm921_vm14 = vweird.f32 %v885_v15 }
 0x2f9   :  { %v902_v56 = vmul.f32 %v2429_v16, %v884_v60  ;;  %2432 = vtanh.f32 %v873_v46  ;;  %vm907_vm6 = vweird.f32 %v2429_v16  ;;  %vm893_vm9 = vmor %vm891_vm7, %vm892_vm5 }
 0x2fa   :  { %v888_v28 = vsub.f32 1.0, %v887_v36  ;;  %vm908_vm10 = vmor %vm906_vm8, %vm907_vm6 }
 0x2fb   :  { %v903_v44 = vsub.f32 1.0, %v902_v56  ;;  %v927_v56 = vand.u32 2147483648, %v885_v15 }
 0x2fc   :  { %v889_v8 = vmul.f32 %v2427_v23, %v888_v28 }
 0x2fd   :  { %v904_v4 = vmul.f32 %v2429_v16, %v903_v44  ;;  %v928_v44 = vor.u32 1.1754944e-38, %v927_v56 }
 0x2fe   :  { %v2431_v27 = vpop.eup %2430  ;;  %v890_v5 = vadd.f32 %v2427_v23, %v889_v8 }
 0x2ff   :  { %v917_v17 = vmul.f32 %v2431_v27, %v885_v15  ;;  %v905_v13 = vadd.f32 %v2429_v16, %v904_v4  ;;  %v2433_v26 = vpop.eup %2432  ;;  %vm922_vm13 = vweird.f32 %v2431_v27 }
 0x300   :  { %v894_v35 = vsel %vm893_vm9, %v2427_v23, %v890_v5  ;;  %v925_v23 = vand.u32 2147483647, %v885_v15  ;;  %vm923_vm15 = vmor %vm921_vm14, %vm922_vm13 }
 0x301   :  { %v918_v45 = vsub.f32 1.0, %v917_v17  ;;  %v899_v33 = vsel %vm896_vm11, %v898_v22, %v894_v35  ;;  %v909_v41 = vsel %vm908_vm10, %v2429_v16, %v905_v13 }
 0x302   :  { %v914_v52 = vsel %vm911_vm12, %v913_v30, %v909_v41  ;;  %v933_v7 = vmul.f32 %v2433_v26, %v899_v33  ;;  %vm926_vm0 = vcmp.eq.f32.partialorder %v925_v23, 8.507059e+37  ;;  %v3195_v30 = vld [vmem:[#allocation27_spill] sm:$0xff] }
 0x303   :  { %v932_v46 = vmul.f32 %v914_v52, %v3006_v57  ;;  %v919_v36 = vmul.f32 %v2431_v27, %v918_v45 }
 0x305   :  { %v3046_v55 = vadd.f32 %v933_v7, %v932_v46  ;;  %v920_v60 = vadd.f32 %v2431_v27, %v919_v36 }
 0x307   :  { %2434 = vtanh.f32 %v3046_v55  ;;  %v924_v28 = vsel %vm923_vm15, %v2431_v27, %v920_v60 }
 0x308   :  { %v929_v63 = vsel %vm926_vm0, %v928_v44, %v924_v28  ;;  %v3196_v44 = vld [vmem:[#allocation28_spill] sm:$0xff] }
 0x30d   :  { %v2435_v16 = vpop.eup %2434 }
 0x30e   :  { %v936_v59 = vmul.f32 %v2435_v16, %v929_v63 }
 0x310   :  { %v937_v8 = vpack.c.bf16 %v936_v59, %v936_v59 }
 0x312   :  { %946 = vmatmul.bf16.vlgmr.msrb.gmra.mxu0 %v937_v8  ;;  %959 = vmatmul.bf16.vlgmr.msrb.gmra.mxu1 %v937_v8 }
 0x313   :  { %972 = vmatmul.bf16.vlgmr.msra.gmra.mxu2 %v937_v8  ;;  %985 = vmatmul.bf16.vlgmr.msra.gmra.mxu3 %v937_v8 }
 0x314   :  { %1178 = vmatpush.bf16.msrb.mxu0 %v2627_v29  ;;  %1191 = vmatpush.bf16.msrb.mxu1 %v2629_v34 }
 0x315   :  { %1204 = vmatpush.bf16.msra.mxu2 %v2635_v38  ;;  %1217 = vmatpush.bf16.msra.mxu3 %v2647_v49 }
 0x318   :  { %1179 = vmatpush.bf16.msrb.mxu0 %v2643_v42  ;;  %1192 = vmatpush.bf16.msrb.mxu1 %v2645_v43 }
 0x319   :  { %1205 = vmatpush.bf16.msra.mxu2 %v2650_v50  ;;  %1218 = vmatpush.bf16.msra.mxu3 %v2659_v61 }
 0x31c   :  { %1180 = vmatpush.bf16.msrb.mxu0 %v2655_v53  ;;  %1193 = vmatpush.bf16.msrb.mxu1 %v2657_v54 }
 0x31d   :  { %1206 = vmatpush.bf16.msra.mxu2 %v2662_v62  ;;  %1219 = vmatpush.bf16.msra.mxu3 %v2676_v9 }
 0x320   :  { %1181 = vmatpush.bf16.msrb.mxu0 %v2672_v1  ;;  %1194 = vmatpush.bf16.msrb.mxu1 %v2674_v2 }
 0x321   :  { %1207 = vmatpush.bf16.msra.mxu2 %v2686_v19  ;;  %1220 = vmatpush.bf16.msra.mxu3 %v2705_v14 }
 0x324   :  { %1182 = vmatpush.bf16.msrb.mxu0 %v2682_v11  ;;  %1195 = vmatpush.bf16.msrb.mxu1 %v2684_v12 }
 0x325   :  { %1208 = vmatpush.bf16.msra.mxu2 %v2703_v31  ;;  %1221 = vmatpush.bf16.msra.mxu3 %v2708_v37 }
 0x328   :  { %1183 = vmatpush.bf16.msrb.mxu0 %v2698_v24  ;;  %1196 = vmatpush.bf16.msrb.mxu1 %v2700_v25 }
 0x329   :  { %1209 = vmatpush.bf16.msra.mxu2 %v2717_v47  ;;  %1222 = vmatpush.bf16.msra.mxu3 %v2742_v3 }
 0x32c   :  { %1184 = vmatpush.bf16.msrb.mxu0 %v2712_v39  ;;  %1197 = vmatpush.bf16.msrb.mxu1 %v2714_v40 }
 0x32d   :  { %1210 = vmatpush.bf16.msra.mxu2 %v2740_v58  ;;  %1223 = vmatpush.bf16.msra.mxu3 %v2750_v0 }
 0x330   :  { %1185 = vmatpush.bf16.msrb.mxu0 %v2722_v48  ;;  %1198 = vmatpush.bf16.msrb.mxu1 %v2724_v51 }
 0x331   :  { %1211 = vmatpush.bf16.msra.mxu2 %v2747_v6  ;;  %1224 = vmatpush.bf16.msra.mxu3 %v2756_v10 }
 0x38f   :  { %v947_v57 = vpop.f32.mrf.mxu0  ;;  %v960_v15 = vpop.f32.mrf.mxu1 }
 0x390   :  { %v990_v4 = vadd.f32 %v947_v57, %v3193_v21  ;;  %v991_v27 = vadd.f32 %v960_v15, %v3194_v32 }
 0x392   :  { %v2061_v5 = vmul.f32 -1.442695, %v990_v4  ;;  %v2062_v17 = vmul.f32 -1.442695, %v991_v27 }
 0x394   :  { %2436 = vpow2.f32 %v2061_v5 }
 0x395   :  { %2438 = vpow2.f32 %v2062_v17 }
 0x396   :  { %v973_v22 = vpop.f32.mrf.mxu2  ;;  %v986_v13 = vpop.f32.mrf.mxu3 }
 0x397   :  { %v992_v35 = vadd.f32 %v973_v22, %v3195_v30  ;;  %v949_v26 = vpop.f32.mrf.mxu0  ;;  %v962_v45 = vpop.f32.mrf.mxu1  ;;  %v993_v16 = vadd.f32 %v986_v13, %v3196_v44 }
 0x399   :  { %v2063_v33 = vmul.f32 -1.442695, %v992_v35 }
 0x39a   :  { %v2437_v41 = vpop.eup %2436 }
 0x39b   :  { %v2439_v52 = vpop.eup %2438  ;;  %v1003_v7 = vadd.f32 1.0, %v2437_v41  ;;  %2440 = vpow2.f32 %v2063_v33 }
 0x39c   :  { %v1004_v46 = vadd.f32 1.0, %v2439_v52 }
 0x39d   :  { %2442 = vrcp.f32 %v1003_v7  ;;  %v1017_v21 = vand.u32 2147483648, %v1003_v7  ;;  %v1015_v27 = vand.u32 2147483647, %v1003_v7  ;;  %vm1011_vm3 = vweird.f32 %v1003_v7 }
 0x39e   :  { %2444 = vrcp.f32 %v1004_v46  ;;  %v975_v36 = vpop.f32.mrf.mxu2  ;;  %v988_v60 = vpop.f32.mrf.mxu3  ;;  %v1032_v4 = vand.u32 2147483648, %v1004_v46  ;;  %v1030_v17 = vand.u32 2147483647, %v1004_v46  ;;  %vm1026_vm4 = vweird.f32 %v1004_v46 }
 0x39f   :  { %v1018_v35 = vor.u32 1.1754944e-38, %v1017_v21  ;;  %vm1016_vm7 = vcmp.eq.f32.partialorder %v1015_v27, 8.507059e+37 }
 0x3a0   :  { %v1033_v45 = vor.u32 1.1754944e-38, %v1032_v4  ;;  %vm1031_vm8 = vcmp.eq.f32.partialorder %v1030_v17, 8.507059e+37 }
 0x3a1   :  { %v2441_v56 = vpop.eup %2440 }
 0x3a2   :  { %v1005_v23 = vadd.f32 1.0, %v2441_v56 }
 0x3a3   :  { %v2443_v28 = vpop.eup %2442 }
 0x3a4   :  { %v2445_v63 = vpop.eup %2444  ;;  %v1007_v59 = vmul.f32 %v2443_v28, %v1003_v7  ;;  %2446 = vrcp.f32 %v1005_v23  ;;  %vm1012_vm1 = vweird.f32 %v2443_v28  ;;  %vm1041_vm10 = vweird.f32 %v1005_v23 }
 0x3a5   :  { %v1022_v8 = vmul.f32 %v2445_v63, %v1004_v46  ;;  %2448 = vtanh.f32 %v993_v16  ;;  %vm1027_vm2 = vweird.f32 %v2445_v63  ;;  %vm1013_vm5 = vmor %vm1011_vm3, %vm1012_vm1 }
 0x3a6   :  { %v1008_v57 = vsub.f32 1.0, %v1007_v59  ;;  %vm1028_vm6 = vmor %vm1026_vm4, %vm1027_vm2 }
 0x3a7   :  { %v1023_v15 = vsub.f32 1.0, %v1022_v8  ;;  %v1047_v8 = vand.u32 2147483648, %v1005_v23 }
 0x3a8   :  { %v1009_v32 = vmul.f32 %v2443_v28, %v1008_v57 }
 0x3a9   :  { %v1024_v5 = vmul.f32 %v2445_v63, %v1023_v15  ;;  %v1048_v15 = vor.u32 1.1754944e-38, %v1047_v8 }
 0x3aa   :  { %v2447_v22 = vpop.eup %2446  ;;  %v1010_v30 = vadd.f32 %v2443_v28, %v1009_v32 }
 0x3ab   :  { %v1037_v13 = vmul.f32 %v2447_v22, %v1005_v23  ;;  %v1025_v26 = vadd.f32 %v2445_v63, %v1024_v5  ;;  %v2449_v41 = vpop.eup %2448  ;;  %vm1042_vm9 = vweird.f32 %v2447_v22 }
 0x3ac   :  { %v1014_v33 = vsel %vm1013_vm5, %v2443_v28, %v1010_v30  ;;  %v1045_v28 = vand.u32 2147483647, %v1005_v23  ;;  %vm1043_vm11 = vmor %vm1041_vm10, %vm1042_vm9 }
 0x3ad   :  { %v1038_v52 = vsub.f32 1.0, %v1037_v13  ;;  %v1019_v36 = vsel %vm1016_vm7, %v1018_v35, %v1014_v33  ;;  %v1029_v60 = vsel %vm1028_vm6, %v2445_v63, %v1025_v26 }
 0x3ae   :  { %v1034_v56 = vsel %vm1031_vm8, %v1033_v45, %v1029_v60  ;;  %v1053_v44 = vmul.f32 %v2449_v41, %v1019_v36  ;;  %vm1046_vm12 = vcmp.eq.f32.partialorder %v1045_v28, 8.507059e+37 }
 0x3af   :  { %v1052_v16 = vmul.f32 %v1034_v56, %v3046_v55  ;;  %v1039_v59 = vmul.f32 %v2447_v22, %v1038_v52 }
 0x3b1   :  { %v3086_v7 = vadd.f32 %v1053_v44, %v1052_v16  ;;  %v1040_v46 = vadd.f32 %v2447_v22, %v1039_v59 }
 0x3b3   :  { %2450 = vtanh.f32 %v3086_v7  ;;  %v1044_v57 = vsel %vm1043_vm11, %v2447_v22, %v1040_v46 }
 0x3b4   :  { %v1049_v21 = vsel %vm1046_vm12, %v1048_v15, %v1044_v57 }
 0x3b9   :  { %v2451_v63 = vpop.eup %2450 }
 0x3ba   :  { %v1056_v4 = vmul.f32 %v2451_v63, %v1049_v21 }
 0x3bc   :  { %v1057_v32 = vpack.c.bf16 %v1056_v4, %v1056_v4 }
 0x3be   :  { %1066 = vmatmul.bf16.vlgmr.msra.gmra.mxu0 %v1057_v32  ;;  %1079 = vmatmul.bf16.vlgmr.msra.gmra.mxu1 %v1057_v32 }
 0x3bf   :  { %1092 = vmatmul.bf16.vlgmr.msrb.gmra.mxu2 %v1057_v32  ;;  %1105 = vmatmul.bf16.vlgmr.msrb.gmra.mxu3 %v1057_v32 }
 0x3c0   :  { %1298 = vmatpush.bf16.msra.mxu0 %v2627_v29  ;;  %1311 = vmatpush.bf16.msra.mxu1 %v2629_v34 }
 0x3c1   :  { %1324 = vmatpush.bf16.msrb.mxu2 %v2635_v38  ;;  %1337 = vmatpush.bf16.msrb.mxu3 %v2647_v49  ;;  %v3197_v38 = vld [vmem:[#allocation23_spill] sm:$0xff] }
 0x3c4   :  { %1299 = vmatpush.bf16.msra.mxu0 %v2643_v42  ;;  %1312 = vmatpush.bf16.msra.mxu1 %v2645_v43  ;;  %v3198_v43 = vld [vmem:[#allocation24_spill] sm:$0xff] }
 0x3c5   :  { %1325 = vmatpush.bf16.msrb.mxu2 %v2650_v50  ;;  %1338 = vmatpush.bf16.msrb.mxu3 %v2659_v61 }
 0x3c8   :  { %1300 = vmatpush.bf16.msra.mxu0 %v2655_v53  ;;  %1313 = vmatpush.bf16.msra.mxu1 %v2657_v54 }
 0x3c9   :  { %1326 = vmatpush.bf16.msrb.mxu2 %v2662_v62  ;;  %1339 = vmatpush.bf16.msrb.mxu3 %v2676_v9  ;;  %v3199_v62 = vld [vmem:[#allocation29_spill] sm:$0xff] }
 0x3cc   :  { %1301 = vmatpush.bf16.msra.mxu0 %v2672_v1  ;;  %1314 = vmatpush.bf16.msra.mxu1 %v2674_v2 }
 0x3cd   :  { %1327 = vmatpush.bf16.msrb.mxu2 %v2686_v19  ;;  %1340 = vmatpush.bf16.msrb.mxu3 %v2705_v14 }
 0x3d0   :  { %1302 = vmatpush.bf16.msra.mxu0 %v2682_v11  ;;  %1315 = vmatpush.bf16.msra.mxu1 %v2684_v12 }
 0x3d1   :  { %1328 = vmatpush.bf16.msrb.mxu2 %v2703_v31  ;;  %1341 = vmatpush.bf16.msrb.mxu3 %v2708_v37 }
 0x3d4   :  { %1303 = vmatpush.bf16.msra.mxu0 %v2698_v24  ;;  %1316 = vmatpush.bf16.msra.mxu1 %v2700_v25 }
 0x3d5   :  { %1329 = vmatpush.bf16.msrb.mxu2 %v2717_v47  ;;  %1342 = vmatpush.bf16.msrb.mxu3 %v2742_v3  ;;  %v3200_v47 = vld [vmem:[#allocation30_spill] sm:$0xff] }
 0x3d8   :  { %1304 = vmatpush.bf16.msra.mxu0 %v2712_v39  ;;  %1317 = vmatpush.bf16.msra.mxu1 %v2714_v40 }
 0x3d9   :  { %1330 = vmatpush.bf16.msrb.mxu2 %v2740_v58  ;;  %1343 = vmatpush.bf16.msrb.mxu3 %v2750_v0 }
 0x3dc   :  { %1305 = vmatpush.bf16.msra.mxu0 %v2722_v48  ;;  %1318 = vmatpush.bf16.msra.mxu1 %v2724_v51 }
 0x3dd   :  { %1331 = vmatpush.bf16.msrb.mxu2 %v2747_v6  ;;  %1344 = vmatpush.bf16.msrb.mxu3 %v2756_v10 }
 0x43b   :  { %v1067_v29 = vpop.f32.mrf.mxu0  ;;  %v1080_v34 = vpop.f32.mrf.mxu1 }
 0x43c   :  { %v1110_v42 = vadd.f32 %v1067_v29, %v3197_v38  ;;  %v1111_v49 = vadd.f32 %v1080_v34, %v3198_v43  ;;  %v3201_v38 = vld [vmem:[#allocation11_spill] sm:$0xff]  ;;  %v3202_v43 = vld [vmem:[#allocation12_spill] sm:$0xff] }
 0x43e   :  { %v2064_v50 = vmul.f32 -1.442695, %v1110_v42  ;;  %v2065_v53 = vmul.f32 -1.442695, %v1111_v49 }
 0x440   :  { %2452 = vpow2.f32 %v2064_v50 }
 0x441   :  { %2454 = vpow2.f32 %v2065_v53 }
 0x442   :  { %v1093_v54 = vpop.f32.mrf.mxu2  ;;  %v1106_v61 = vpop.f32.mrf.mxu3 }
 0x443   :  { %v1112_v1 = vadd.f32 %v1093_v54, %v3199_v62  ;;  %v1069_v2 = vpop.f32.mrf.mxu0  ;;  %v1082_v9 = vpop.f32.mrf.mxu1  ;;  %v1113_v48 = vadd.f32 %v1106_v61, %v3200_v47  ;;  %v3203_v62 = vld [vmem:[#allocation31_spill] sm:$0xff]  ;;  %v3204_v47 = vld [vmem:[#allocation32_spill] sm:$0xff] }
 0x445   :  { %v2066_v11 = vmul.f32 -1.442695, %v1112_v1 }
 0x446   :  { %v2453_v12 = vpop.eup %2452 }
 0x447   :  { %v2455_v19 = vpop.eup %2454  ;;  %v1123_v24 = vadd.f32 1.0, %v2453_v12  ;;  %2456 = vpow2.f32 %v2066_v11 }
 0x448   :  { %v1124_v25 = vadd.f32 1.0, %v2455_v19 }
 0x449   :  { %2458 = vrcp.f32 %v1123_v24  ;;  %v1137_v10 = vand.u32 2147483648, %v1123_v24  ;;  %v1135_v27 = vand.u32 2147483647, %v1123_v24  ;;  %vm1131_vm15 = vweird.f32 %v1123_v24 }
 0x44a   :  { %2460 = vrcp.f32 %v1124_v25  ;;  %v1095_v31 = vpop.f32.mrf.mxu2  ;;  %v1108_v14 = vpop.f32.mrf.mxu3  ;;  %v1152_v55 = vand.u32 2147483648, %v1124_v25  ;;  %v1150_v17 = vand.u32 2147483647, %v1124_v25  ;;  %vm1146_vm0 = vweird.f32 %v1124_v25 }
 0x44b   :  { %v1138_v35 = vor.u32 1.1754944e-38, %v1137_v10  ;;  %vm1136_vm3 = vcmp.eq.f32.partialorder %v1135_v27, 8.507059e+37 }
 0x44c   :  { %v1153_v45 = vor.u32 1.1754944e-38, %v1152_v55  ;;  %vm1151_vm4 = vcmp.eq.f32.partialorder %v1150_v17, 8.507059e+37 }
 0x44d   :  { %v2457_v37 = vpop.eup %2456 }
 0x44e   :  { %v1125_v39 = vadd.f32 1.0, %v2457_v37 }
 0x44f   :  { %v2459_v40 = vpop.eup %2458 }
 0x450   :  { %v2461_v51 = vpop.eup %2460  ;;  %v1127_v58 = vmul.f32 %v2459_v40, %v1123_v24  ;;  %2462 = vrcp.f32 %v1125_v39  ;;  %vm1132_vm13 = vweird.f32 %v2459_v40  ;;  %v1167_v28 = vand.u32 2147483648, %v1125_v39 }
 0x451   :  { %v1142_v3 = vmul.f32 %v2461_v51, %v1124_v25  ;;  %2464 = vtanh.f32 %v1113_v48  ;;  %vm1147_vm14 = vweird.f32 %v2461_v51  ;;  %vm1133_vm1 = vmor %vm1131_vm15, %vm1132_vm13  ;;  %vm1161_vm6 = vweird.f32 %v1125_v39 }
 0x452   :  { %v1128_v6 = vsub.f32 1.0, %v1127_v58  ;;  %vm1148_vm2 = vmor %vm1146_vm0, %vm1147_vm14  ;;  %v1165_v57 = vand.u32 2147483647, %v1125_v39  ;;  %v1168_v63 = vor.u32 1.1754944e-38, %v1167_v28 }
 0x453   :  { %v1143_v0 = vsub.f32 1.0, %v1142_v3 }
 0x454   :  { %v1129_v23 = vmul.f32 %v2459_v40, %v1128_v6  ;;  %vm1166_vm8 = vcmp.eq.f32.partialorder %v1165_v57, 8.507059e+37 }
 0x455   :  { %v1144_v5 = vmul.f32 %v2461_v51, %v1143_v0 }
 0x456   :  { %v2463_v22 = vpop.eup %2462  ;;  %v1130_v30 = vadd.f32 %v2459_v40, %v1129_v23 }
 0x457   :  { %v1157_v13 = vmul.f32 %v2463_v22, %v1125_v39  ;;  %v1145_v26 = vadd.f32 %v2461_v51, %v1144_v5  ;;  %v2465_v41 = vpop.eup %2464  ;;  %vm1162_vm5 = vweird.f32 %v2463_v22 }
 0x458   :  { %v1134_v33 = vsel %vm1133_vm1, %v2459_v40, %v1130_v30  ;;  %vm1163_vm7 = vmor %vm1161_vm6, %vm1162_vm5 }
 0x459   :  { %v1158_v52 = vsub.f32 1.0, %v1157_v13  ;;  %v1139_v36 = vsel %vm1136_vm3, %v1138_v35, %v1134_v33  ;;  %v1149_v60 = vsel %vm1148_vm2, %v2461_v51, %v1145_v26 }
 0x45a   :  { %v1154_v56 = vsel %vm1151_vm4, %v1153_v45, %v1149_v60  ;;  %v1173_v44 = vmul.f32 %v2465_v41, %v1139_v36 }
 0x45b   :  { %v1172_v16 = vmul.f32 %v1154_v56, %v3086_v7  ;;  %v1159_v59 = vmul.f32 %v2463_v22, %v1158_v52 }
 0x45d   :  { %v3126_v46 = vadd.f32 %v1173_v44, %v1172_v16  ;;  %v1160_v8 = vadd.f32 %v2463_v22, %v1159_v59 }
 0x45f   :  { %2466 = vtanh.f32 %v3126_v46  ;;  %v1164_v15 = vsel %vm1163_vm7, %v2463_v22, %v1160_v8 }
 0x460   :  { %v1169_v4 = vsel %vm1166_vm8, %v1168_v63, %v1164_v15 }
 0x465   :  { %v2467_v21 = vpop.eup %2466 }
 0x466   :  { %v1176_v32 = vmul.f32 %v2467_v21, %v1169_v4 }
 0x468   :  { %v1177_v29 = vpack.c.bf16 %v1176_v32, %v1176_v32 }
 0x46a   :  { %1186 = vmatmul.bf16.vlgmr.msrb.gmra.mxu0 %v1177_v29  ;;  %1199 = vmatmul.bf16.vlgmr.msrb.gmra.mxu1 %v1177_v29 }
 0x46b   :  { %1212 = vmatmul.bf16.vlgmr.msra.gmra.mxu2 %v1177_v29  ;;  %1225 = vmatmul.bf16.vlgmr.msra.gmra.mxu3 %v1177_v29 }
 0x4e7   :  { %v1187_v7 = vpop.f32.mrf.mxu0  ;;  %v1200_v34 = vpop.f32.mrf.mxu1 }
 0x4e8   :  { %v1230_v42 = vadd.f32 %v1187_v7, %v3201_v38  ;;  %v1231_v49 = vadd.f32 %v1200_v34, %v3202_v43  ;;  %v2316_v34 = vld [vmem:[#allocation5 + $0x30] sm:$0xff]  ;;  %v2315_v38 = vld [vmem:[#allocation5 + $0x28] sm:$0xff]  ;;  %v2313_v43 = vld [vmem:[#allocation5 + $0x18] sm:$0xff] }
 0x4ea   :  { %v2067_v50 = vmul.f32 -1.442695, %v1230_v42  ;;  %v2068_v53 = vmul.f32 -1.442695, %v1231_v49  ;;  %v2314_v42 = vld [vmem:[#allocation5 + $0x20] sm:$0xff]  ;;  %v3205_v49 = vld [vmem:[#allocation13_spill] sm:$0xff] }
 0x4ec   :  { %2468 = vpow2.f32 %v2067_v50  ;;  %v177_v50 = vadd.f32 %v3205_v49, %v2826_v18 }
 0x4ed   :  { %2470 = vpow2.f32 %v2068_v53  ;;  %v3206_v53 = vld [vmem:[#allocation14_spill] sm:$0xff] }
 0x4ee   :  { %v1213_v54 = vpop.f32.mrf.mxu2  ;;  %v1226_v61 = vpop.f32.mrf.mxu3 }
 0x4ef   :  { %v1232_v1 = vadd.f32 %v1213_v54, %v3203_v62  ;;  %v1189_v2 = vpop.f32.mrf.mxu0  ;;  %v1202_v9 = vpop.f32.mrf.mxu1  ;;  %v1233_v48 = vadd.f32 %v1226_v61, %v3204_v47  ;;  %v206_v54 = vadd.f32 %v3206_v53, %v2828_v20  ;;  %v2310_v20 = vld [vmem:[#allocation5] sm:$0xff] }
 0x4f0   :  { %v2312_v9 = vld [vmem:[#allocation5 + $0x10] sm:$0xff] }
 0x4f1   :  { %v2069_v11 = vmul.f32 -1.442695, %v1232_v1 }
 0x4f2   :  { %v2469_v12 = vpop.eup %2468 }
 0x4f3   :  { %v2471_v19 = vpop.eup %2470  ;;  %v1243_v24 = vadd.f32 1.0, %v2469_v12  ;;  %2472 = vpow2.f32 %v2069_v11 }
 0x4f4   :  { %v1244_v25 = vadd.f32 1.0, %v2471_v19  ;;  %v2311_v19 = vld [vmem:[#allocation5 + $0x8] sm:$0xff] }
 0x4f5   :  { %2474 = vrcp.f32 %v1243_v24  ;;  %v1257_v10 = vand.u32 2147483648, %v1243_v24  ;;  %v1255_v27 = vand.u32 2147483647, %v1243_v24  ;;  %vm1251_vm11 = vweird.f32 %v1243_v24 }
 0x4f6   :  { %2476 = vrcp.f32 %v1244_v25  ;;  %v1215_v31 = vpop.f32.mrf.mxu2  ;;  %v1228_v14 = vpop.f32.mrf.mxu3  ;;  %v1272_v55 = vand.u32 2147483648, %v1244_v25  ;;  %v1270_v17 = vand.u32 2147483647, %v1244_v25  ;;  %vm1266_vm12 = vweird.f32 %v1244_v25 }
 0x4f7   :  { %v1258_v35 = vor.u32 1.1754944e-38, %v1257_v10  ;;  %vm1256_vm15 = vcmp.eq.f32.partialorder %v1255_v27, 8.507059e+37  ;;  %v3207_v31 = vld [vmem:[#allocation33_spill] sm:$0xff]  ;;  %v3208_v27 = vld [vmem:[#allocation34_spill] sm:$0xff] }
 0x4f8   :  { %v1273_v45 = vor.u32 1.1754944e-38, %v1272_v55  ;;  %vm1271_vm0 = vcmp.eq.f32.partialorder %v1270_v17, 8.507059e+37 }
 0x4f9   :  { %v2473_v37 = vpop.eup %2472 }
 0x4fa   :  { %v1245_v39 = vadd.f32 1.0, %v2473_v37 }
 0x4fb   :  { %v2475_v40 = vpop.eup %2474 }
 0x4fc   :  { %v2477_v51 = vpop.eup %2476  ;;  %v1247_v58 = vmul.f32 %v2475_v40, %v1243_v24  ;;  %2478 = vrcp.f32 %v1245_v39  ;;  %vm1252_vm9 = vweird.f32 %v2475_v40  ;;  %v1287_v57 = vand.u32 2147483648, %v1245_v39 }
 0x4fd   :  { %v1262_v3 = vmul.f32 %v2477_v51, %v1244_v25  ;;  %2480 = vtanh.f32 %v1233_v48  ;;  %vm1267_vm10 = vweird.f32 %v2477_v51  ;;  %vm1253_vm13 = vmor %vm1251_vm11, %vm1252_vm9  ;;  %vm1281_vm2 = vweird.f32 %v1245_v39 }
 0x4fe   :  { %v1248_v6 = vsub.f32 1.0, %v1247_v58  ;;  %vm1268_vm14 = vmor %vm1266_vm12, %vm1267_vm10  ;;  %v1285_v15 = vand.u32 2147483647, %v1245_v39  ;;  %v1288_v21 = vor.u32 1.1754944e-38, %v1287_v57 }
 0x4ff   :  { %v1263_v0 = vsub.f32 1.0, %v1262_v3 }
 0x500   :  { %v1249_v23 = vmul.f32 %v2475_v40, %v1248_v6  ;;  %vm1286_vm4 = vcmp.eq.f32.partialorder %v1285_v15, 8.507059e+37  ;;  %v2325_v6 = vld [vmem:[#allocation5 + $0x78] sm:$0xff] }
 0x501   :  { %v1264_v5 = vmul.f32 %v2477_v51, %v1263_v0  ;;  %1565 = vmatpush.bf16.msrb.mxu1 %v2325_v6  ;;  %v2324_v0 = vld [vmem:[#allocation5 + $0x70] sm:$0xff] }
 0x502   :  { %v2479_v22 = vpop.eup %2478  ;;  %v1250_v30 = vadd.f32 %v2475_v40, %v1249_v23  ;;  %v2238_v6 = vld [vmem:[#allocation2 + $0x210] sm:$0xf0] }
 0x503   :  { %v1277_v13 = vmul.f32 %v2479_v22, %v1245_v39  ;;  %v1265_v26 = vadd.f32 %v2477_v51, %v1264_v5  ;;  %v2481_v41 = vpop.eup %2480  ;;  %vm1282_vm1 = vweird.f32 %v2479_v22 }
 0x504   :  { %v1254_v33 = vsel %vm1253_vm13, %v2475_v40, %v1250_v30  ;;  %vm1283_vm3 = vmor %vm1281_vm2, %vm1282_vm1  ;;  %v2323_v30 = vld [vmem:[#allocation5 + $0x68] sm:$0xff] }
 0x505   :  { %v1278_v52 = vsub.f32 1.0, %v1277_v13  ;;  %v1259_v36 = vsel %vm1256_vm15, %v1258_v35, %v1254_v33  ;;  %v1269_v60 = vsel %vm1268_vm14, %v2477_v51, %v1265_v26  ;;  %1566 = vmatpush.bf16.msrb.mxu1 %v2324_v0 }
 0x506   :  { %v1274_v56 = vsel %vm1271_vm0, %v1273_v45, %v1269_v60  ;;  %v1293_v44 = vmul.f32 %v2481_v41, %v1259_v36  ;;  %v2322_v36 = vld [vmem:[#allocation5 + $0x60] sm:$0xff] }
 0x507   :  { %v1292_v16 = vmul.f32 %v1274_v56, %v3126_v46  ;;  %v1279_v59 = vmul.f32 %v2479_v22, %v1278_v52  ;;  %v2317_v46 = vld [vmem:[#allocation5 + $0x38] sm:$0xff] }
 0x508   :  { %1484 = vmatpush.bf16.msrb.mxu0 %v2317_v46 }
 0x509   :  { %v3134_v8 = vadd.f32 %v1293_v44, %v1292_v16  ;;  %v1280_v28 = vadd.f32 %v2479_v22, %v1279_v59  ;;  %1567 = vmatpush.bf16.msrb.mxu1 %v2323_v30  ;;  %v2348_v30 = vld [vmem:[#allocation2 + $0x1ec] sm:$0xf0] }
 0x50b   :  { %2482 = vtanh.f32 %v3134_v8  ;;  %v1284_v63 = vsel %vm1283_vm3, %v2479_v22, %v1280_v28 }
 0x50c   :  { %v1289_v32 = vsel %vm1286_vm4, %v1288_v21, %v1284_v63  ;;  %1485 = vmatpush.bf16.msrb.mxu0 %v2316_v34  ;;  %v2321_v21 = vld [vmem:[#allocation5 + $0x58] sm:$0xff] }
 0x50d   :  { %1568 = vmatpush.bf16.msrb.mxu1 %v2322_v36  ;;  %v2230_v36 = vld [vmem:[#allocation2 + $0x1f8] sm:$0xf0] }
 0x510   :  { %1486 = vmatpush.bf16.msrb.mxu0 %v2315_v38 }
 0x511   :  { %v2483_v4 = vpop.eup %2482  ;;  %1569 = vmatpush.bf16.msrb.mxu1 %v2321_v21  ;;  %v2343_v21 = vld [vmem:[#allocation2 + $0x1cc] sm:$0xf] }
 0x512   :  { %v1296_v29 = vmul.f32 %v2483_v4, %v1289_v32 }
 0x514   :  { %v1297_v7 = vpack.c.bf16 %v1296_v29, %v1296_v29  ;;  %1487 = vmatpush.bf16.msrb.mxu0 %v2314_v42 }
 0x516   :  { %1306 = vmatmul.bf16.vlgmr.msra.gmra.mxu0 %v1297_v7  ;;  %1319 = vmatmul.bf16.vlgmr.msra.gmra.mxu1 %v1297_v7 }
 0x517   :  { %1332 = vmatmul.bf16.vlgmr.msrb.gmra.mxu2 %v1297_v7  ;;  %1345 = vmatmul.bf16.vlgmr.msrb.gmra.mxu3 %v1297_v7 }
 0x518   :  { %1488 = vmatpush.bf16.msrb.mxu0 %v2313_v43  ;;  %v2320_v43 = vld [vmem:[#allocation5 + $0x50] sm:$0xff] }
 0x519   :  { %1570 = vmatpush.bf16.msrb.mxu1 %v2320_v43  ;;  %v2190_v43 = vld [vmem:[#allocation2 + $0x1b0] sm:$0xf0] }
 0x51c   :  { %1489 = vmatpush.bf16.msrb.mxu0 %v2312_v9 }
 0x520   :  { %1490 = vmatpush.bf16.msrb.mxu0 %v2311_v19  ;;  %v2252_v19 = vld [vmem:[#allocation2 + $0x220] sm:$0xf] }
 0x524   :  { %1491 = vmatpush.bf16.msrb.mxu0 %v2310_v20 }
 0x593   :  { %v1307_v61 = vpop.f32.mrf.mxu0  ;;  %v1320_v62 = vpop.f32.mrf.mxu1 }
 0x594   :  { %v1350_v1 = vadd.f32 %v1307_v61, %v177_v50  ;;  %v1351_v2 = vadd.f32 %v1320_v62, %v206_v54 }
 0x596   :  { %v2070_v11 = vmul.f32 -1.442695, %v1350_v1  ;;  %v2071_v12 = vmul.f32 -1.442695, %v1351_v2 }
 0x598   :  { %2484 = vpow2.f32 %v2070_v11 }
 0x599   :  { %2486 = vpow2.f32 %v2071_v12  ;;  %v2318_v12 = vld [vmem:[#allocation5 + $0x40] sm:$0xff] }
 0x59a   :  { %v1333_v24 = vpop.f32.mrf.mxu2  ;;  %v1346_v25 = vpop.f32.mrf.mxu3 }
 0x59b   :  { %v1352_v14 = vadd.f32 %v1333_v24, %v3207_v31  ;;  %v1309_v18 = vpop.f32.mrf.mxu0  ;;  %v1322_v37 = vpop.f32.mrf.mxu1  ;;  %v1353_v5 = vadd.f32 %v1346_v25, %v3208_v27  ;;  %v2356_v24 = vld [vmem:[#allocation2 + $0x22c] sm:$0xf0]  ;;  %v2354_v25 = vld [vmem:[#allocation2 + $0x224] sm:$0xf]  ;;  %v2351_v27 = vld [vmem:[#allocation2 + $0x20c] sm:$0xf] }
 0x59c   :  { %v2253_v31 = vor.u32 %v2356_v24, %v2252_v19  ;;  %v2260_v18 = vld [vmem:[#allocation2 + $0x228] sm:$0xf]  ;;  %v2357_v37 = vld [vmem:[#allocation2 + $0x234] sm:$0xf0] }
 0x59d   :  { %v2072_v39 = vmul.f32 -1.442695, %v1352_v14  ;;  %v2254_v14 = vld [vmem:[#allocation2 + $0x230] sm:$0xf0]  ;;  %v2180_v19 = vld [vmem:[#allocation2 + $0x188] sm:$0xf] }
 0x59e   :  { %v2485_v40 = vpop.eup %2484  ;;  %v2257_v20 = vor.u32 %v2354_v25, %v2254_v14  ;;  %1783 = vmatpush.bf16.msra.mxu2 %v2253_v31  ;;  %v2337_v24 = vld [vmem:[#allocation2 + $0x194] sm:$0xf0]  ;;  %v2335_v25 = vld [vmem:[#allocation2 + $0x18c] sm:$0xf]  ;;  %v2182_v31 = vld [vmem:[#allocation2 + $0x198] sm:$0xf0] }
 0x59f   :  { %v2487_v47 = vpop.eup %2486  ;;  %v1363_v48 = vadd.f32 1.0, %v2485_v40  ;;  %2488 = vpow2.f32 %v2072_v39  ;;  %v2261_v39 = vor.u32 %v2357_v37, %v2260_v18  ;;  %v2355_v40 = vld [vmem:[#allocation2 + $0x22c] sm:$0xf]  ;;  %v2181_v37 = vor.u32 %v2337_v24, %v2180_v19 }
 0x5a0   :  { %v1364_v51 = vadd.f32 1.0, %v2487_v47  ;;  %v2262_v47 = vld [vmem:[#allocation2 + $0x238] sm:$0xf0]  ;;  %1796 = vmatpush.bf16.msra.mxu3 %v2257_v20  ;;  %v2370_v20 = vld [vmem:[%s3159_s3 + $0x1] ss:$0 sm:$0xff] }
 0x5a1   :  { %2490 = vrcp.f32 %v1363_v48  ;;  %v1377_v45 = vand.u32 2147483648, %v1363_v48  ;;  %v1375_v52 = vand.u32 2147483647, %v1363_v48  ;;  %vm1371_vm7 = vweird.f32 %v1363_v48  ;;  %1809 = vmatpush.bf16.msra.mxu0 %v2261_v39 }
 0x5a2   :  { %2492 = vrcp.f32 %v1364_v51  ;;  %v1335_v58 = vpop.f32.mrf.mxu2  ;;  %v1348_v3 = vpop.f32.mrf.mxu3  ;;  %v1392_v33 = vand.u32 2147483648, %v1364_v51  ;;  %v1390_v56 = vand.u32 2147483647, %v1364_v51  ;;  %vm1386_vm8 = vweird.f32 %v1364_v51 }
 0x5a3   :  { %v1378_v28 = vor.u32 1.1754944e-38, %v1377_v45  ;;  %vm1376_vm11 = vcmp.eq.f32.partialorder %v1375_v52, 8.507059e+37  ;;  %v2352_v58 = vld [vmem:[#allocation2 + $0x20c] sm:$0xf0]  ;;  %v2350_v3 = vld [vmem:[#allocation2 + $0x204] sm:$0xf]  ;;  %v2185_v39 = vor.u32 %v2335_v25, %v2182_v31 }
 0x5a4   :  { %v1393_v15 = vor.u32 1.1754944e-38, %v1392_v33  ;;  %vm1391_vm12 = vcmp.eq.f32.partialorder %v1390_v56, 8.507059e+37  ;;  %v2228_v45 = vld [vmem:[#allocation2 + $0x1e8] sm:$0xf]  ;;  %v2347_v52 = vld [vmem:[#allocation2 + $0x1ec] sm:$0xf] }
 0x5a5   :  { %v2489_v10 = vpop.eup %2488 }
 0x5a6   :  { %v1365_v55 = vadd.f32 1.0, %v2489_v10  ;;  %v2241_v10 = vor.u32 %v2350_v3, %v2238_v6  ;;  %v2156_v3 = vld [vmem:[#allocation2 + $0x160] sm:$0xf]  ;;  %v2332_v6 = vld [vmem:[#allocation2 + $0x16c] sm:$0xf0] }
 0x5a7   :  { %v2491_v23 = vpop.eup %2490 }
 0x5a8   :  { %v2493_v17 = vpop.eup %2492  ;;  %v1367_v22 = vmul.f32 %v2491_v23, %v1363_v48  ;;  %2494 = vrcp.f32 %v1365_v55  ;;  %vm1372_vm5 = vweird.f32 %v2491_v23  ;;  %v1407_v53 = vand.u32 2147483648, %v1365_v55  ;;  %v2236_v48 = vld [vmem:[#allocation2 + $0x200] sm:$0xf]  ;;  %1797 = vmatpush.bf16.msra.mxu3 %v2241_v10 }
 0x5a9   :  { %v1382_v13 = vmul.f32 %v2493_v17, %v1364_v51  ;;  %2496 = vtanh.f32 %v1353_v5  ;;  %vm1387_vm6 = vweird.f32 %v2493_v17  ;;  %vm1373_vm9 = vmor %vm1371_vm7, %vm1372_vm5  ;;  %vm1401_vm14 = vweird.f32 %v1365_v55 }
 0x5aa   :  { %v1368_v35 = vsub.f32 1.0, %v1367_v22  ;;  %vm1388_vm10 = vmor %vm1386_vm8, %vm1387_vm6  ;;  %v1405_v54 = vand.u32 2147483647, %v1365_v55  ;;  %v1408_v62 = vor.u32 1.1754944e-38, %v1407_v53  ;;  %v2265_v51 = vor.u32 %v2355_v40, %v2262_v47  ;;  %v2220_v22 = vld [vmem:[#allocation2 + $0x1e0] sm:$0xf] }
 0x5ab   :  { %v1383_v26 = vsub.f32 1.0, %v1382_v13  ;;  %v2237_v0 = vor.u32 %v2352_v58, %v2236_v48  ;;  %v2221_v33 = vor.u32 %v2348_v30, %v2220_v22  ;;  %v2339_v53 = vld [vmem:[#allocation2 + $0x1ac] sm:$0xf]  ;;  %v2157_v10 = vor.u32 %v2332_v6, %v2156_v3  ;;  %v2166_v30 = vld [vmem:[#allocation2 + $0x178] sm:$0xf0] }
 0x5ac   :  { %v1369_v41 = vmul.f32 %v2491_v23, %v1368_v35  ;;  %vm1406_vm0 = vcmp.eq.f32.partialorder %v1405_v54, 8.507059e+37  ;;  %v2346_v35 = vld [vmem:[#allocation2 + $0x1e4] sm:$0xf]  ;;  %v2198_v54 = vld [vmem:[#allocation2 + $0x1b8] sm:$0xf0] }
 0x5ad   :  { %v1384_v60 = vmul.f32 %v2493_v17, %v1383_v26  ;;  %v2222_v26 = vld [vmem:[#allocation2 + $0x1f0] sm:$0xf0]  ;;  %1784 = vmatpush.bf16.msra.mxu2 %v2237_v0  ;;  %v2330_v0 = vld [vmem:[#allocation2 + $0x164] sm:$0xf]  ;;  %v2331_v22 = vld [vmem:[#allocation2 + $0x16c] sm:$0xf] }
 0x5ae   :  { %v2495_v44 = vpop.eup %2494  ;;  %v1370_v16 = vadd.f32 %v2491_v23, %v1369_v41  ;;  %v2349_v41 = vld [vmem:[#allocation2 + $0x1f4] sm:$0xf0] }
 0x5af   :  { %v1397_v59 = vmul.f32 %v2495_v44, %v1365_v55  ;;  %v1385_v57 = vadd.f32 %v2493_v17, %v1384_v60  ;;  %v2497_v4 = vpop.eup %2496  ;;  %vm1402_vm13 = vweird.f32 %v2495_v44  ;;  %v2244_v55 = vld [vmem:[#allocation2 + $0x208] sm:$0xf]  ;;  %v2225_v60 = vor.u32 %v2346_v35, %v2222_v26  ;;  %v2140_v35 = vld [vmem:[#allocation2 + $0x140] sm:$0xf]  ;;  %v2328_v26 = vld [vmem:[#allocation2 + $0x14c] sm:$0xf0] }
 0x5b0   :  { %v1374_v63 = vsel %vm1373_vm9, %v2491_v23, %v1370_v16  ;;  %vm1403_vm15 = vmor %vm1401_vm14, %vm1402_vm13  ;;  %v2353_v23 = vld [vmem:[#allocation2 + $0x214] sm:$0xf0]  ;;  %v2229_v56 = vor.u32 %v2349_v41, %v2228_v45  ;;  %v2344_v16 = vld [vmem:[#allocation2 + $0x1cc] sm:$0xf0] }
 0x5b1   :  { %v1398_v32 = vsub.f32 1.0, %v1397_v59  ;;  %v1379_v29 = vsel %vm1376_vm11, %v1378_v28, %v1374_v63  ;;  %v1389_v7 = vsel %vm1388_vm10, %v2493_v17, %v1385_v57  ;;  %v2245_v5 = vor.u32 %v2353_v23, %v2244_v55  ;;  %v2246_v17 = vld [vmem:[#allocation2 + $0x218] sm:$0xf0]  ;;  %v2342_v59 = vld [vmem:[#allocation2 + $0x1c4] sm:$0xf]  ;;  %1785 = vmatpush.bf16.msra.mxu2 %v2221_v33  ;;  %1798 = vmatpush.bf16.msra.mxu3 %v2225_v60 }
 0x5b2   :  { %v1394_v46 = vsel %vm1391_vm12, %v1393_v15, %v1389_v7  ;;  %v1413_v34 = vmul.f32 %v2497_v4, %v1379_v29  ;;  %v2249_v13 = vor.u32 %v2351_v27, %v2246_v17  ;;  %v2233_v28 = vor.u32 %v2347_v52, %v2230_v36  ;;  %v2206_v57 = vld [vmem:[#allocation2 + $0x1d0] sm:$0xf0]  ;;  %v2212_v15 = vld [vmem:[#allocation2 + $0x1c8] sm:$0xf]  ;;  %v2345_v63 = vld [vmem:[#allocation2 + $0x1d4] sm:$0xf0] }
 0x5b3   :  { %v1412_v38 = vmul.f32 %v1394_v46, %v3134_v8  ;;  %v1399_v42 = vmul.f32 %v2495_v44, %v1398_v32  ;;  %v2319_v8 = vld [vmem:[#allocation5 + $0x48] sm:$0xff]  ;;  %1810 = vmatpush.bf16.msra.mxu0 %v2245_v5  ;;  %v2214_v4 = vld [vmem:[#allocation2 + $0x1d8] sm:$0xf0]  ;;  %v2209_v29 = vor.u32 %v2342_v59, %v2206_v57  ;;  %v2213_v7 = vor.u32 %v2345_v63, %v2212_v15  ;;  %v2188_v46 = vld [vmem:[#allocation2 + $0x1a0] sm:$0xf] }
 0x5b4   :  { %1571 = vmatpush.bf16.msrb.mxu1 %v2319_v8  ;;  %v2201_v8 = vor.u32 %v2339_v53, %v2198_v54  ;;  %v2158_v55 = vld [vmem:[#allocation2 + $0x170] sm:$0xf0]  ;;  %v2164_v23 = vld [vmem:[#allocation2 + $0x168] sm:$0xf]  ;;  %v2333_v27 = vld [vmem:[#allocation2 + $0x174] sm:$0xf0]  ;;  %v2141_v33 = vor.u32 %v2328_v26, %v2140_v35 }
 0x5b5   :  { %v1414_v49 = vadd.f32 %v1413_v34, %v1412_v38  ;;  %v1400_v50 = vadd.f32 %v2495_v44, %v1399_v42  ;;  %v2340_v34 = vld [vmem:[#allocation2 + $0x1ac] sm:$0xf0]  ;;  %v2338_v38 = vld [vmem:[#allocation2 + $0x1a4] sm:$0xf]  ;;  %v2217_v42 = vor.u32 %v2343_v21, %v2214_v4  ;;  %1799 = vmatpush.bf16.msra.mxu3 %v2209_v29  ;;  %v2161_v5 = vor.u32 %v2330_v0, %v2158_v55  ;;  %v2142_v41 = vld [vmem:[#allocation2 + $0x150] sm:$0xf0] }
 0x5b6   :  { %v2165_v17 = vor.u32 %v2333_v27, %v2164_v23  ;;  %v2326_v45 = vld [vmem:[#allocation2 + $0x144] sm:$0xf]  ;;  %v2148_v52 = vld [vmem:[#allocation2 + $0x148] sm:$0xf]  ;;  %v2329_v36 = vld [vmem:[#allocation2 + $0x154] sm:$0xf0] }
 0x5b7   :  { %2498 = vtanh.f32 %v1414_v49  ;;  %v1404_v61 = vsel %vm1403_vm15, %v2495_v44, %v1400_v50  ;;  %v2204_v44 = vld [vmem:[#allocation2 + $0x1c0] sm:$0xf]  ;;  %1811 = vmatpush.bf16.msra.mxu0 %v2229_v56  ;;  %v2196_v49 = vld [vmem:[#allocation2 + $0x1a8] sm:$0xf]  ;;  %v2341_v50 = vld [vmem:[#allocation2 + $0x1b4] sm:$0xf0]  ;;  %v2145_v60 = vor.u32 %v2326_v45, %v2142_v41  ;;  %v2149_v56 = vor.u32 %v2329_v36, %v2148_v52 }
 0x5b8   :  { %v1409_v2 = vsel %vm1406_vm0, %v1408_v62, %v1404_v61  ;;  %1572 = vmatpush.bf16.msrb.mxu1 %v2318_v12  ;;  %v2205_v32 = vor.u32 %v2344_v16, %v2204_v44  ;;  %v2189_v61 = vor.u32 %v2340_v34, %v2188_v46  ;;  %v2193_v62 = vor.u32 %v2338_v38, %v2190_v43  ;;  %v2174_v12 = vld [vmem:[#allocation2 + $0x190] sm:$0xf0]  ;;  %v2327_v44 = vld [vmem:[#allocation2 + $0x14c] sm:$0xf]  ;;  %v2150_v16 = vld [vmem:[#allocation2 + $0x158] sm:$0xf0] }
 0x5b9   :  { %v2153_v59 = vor.u32 %v2327_v44, %v2150_v16 }
 0x5ba   :  { %1786 = vmatpush.bf16.msra.mxu2 %v2205_v32  ;;  %1800 = vmatpush.bf16.msra.mxu3 %v2193_v62  ;;  %v2137_v32 = vld [vmem:[%s3159_s3 + $0x3] ss:$4 sm:$0xf] }
 0x5bb   :  { %1812 = vmatpush.bf16.msra.mxu0 %v2213_v7  ;;  %v1617_v29 = vperm.slane %v2137_v32, 2  ;;  %v1618_v7 = vperm.slane %v2137_v32, 3  ;;  %v1615_v43 = vperm.slane %v2137_v32, 0 }
 0x5bc   :  { %1822 = vmatpush.bf16.msra.mxu1 %v2265_v51 }
 0x5bd   :  { %v2499_v1 = vpop.eup %2498 }
 0x5be   :  { %v1416_v9 = vmul.f32 %v2499_v1, %v1409_v2  ;;  %v2197_v1 = vor.u32 %v2341_v50, %v2196_v49  ;;  %v2172_v2 = vld [vmem:[#allocation2 + $0x180] sm:$0xf]  ;;  %1787 = vmatpush.bf16.msra.mxu2 %v2189_v61  ;;  %v1616_v49 = vperm.slane %v2137_v32, 1 }
 0x5c0   :  { %v1417_v11 = vpack.c.bf16 %v1416_v9, %v1416_v9  ;;  %1823 = vmatpush.bf16.msra.mxu1 %v2249_v13  ;;  %v2336_v9 = vld [vmem:[#allocation2 + $0x18c] sm:$0xf0]  ;;  %1813 = vmatpush.bf16.msra.mxu0 %v2197_v1  ;;  %v2169_v13 = vor.u32 %v2331_v22, %v2166_v30 }
 0x5c1   :  { %v2173_v14 = vor.u32 %v2336_v9, %v2172_v2 }
 0x5c2   :  { %1492 = vmatmul.bf16.vlgmr.msrb.gmra.mxu0 %v1417_v11  ;;  %v2334_v11 = vld [vmem:[#allocation2 + $0x184] sm:$0xf] }
 0x5c3   :  { %v2177_v18 = vor.u32 %v2334_v11, %v2174_v12  ;;  %1788 = vmatpush.bf16.msra.mxu2 %v2173_v14 }
 0x5c4   :  { %1824 = vmatpush.bf16.msra.mxu1 %v2233_v28  ;;  %1814 = vmatpush.bf16.msra.mxu0 %v2181_v37  ;;  %v2371_v28 = vld [vmem:[%s3159_s3 + $0x2] ss:$0 sm:$0xff] }
 0x5c5   :  { %1801 = vmatpush.bf16.msra.mxu3 %v2177_v18 }
 0x5c7   :  { %1789 = vmatpush.bf16.msra.mxu2 %v2157_v10 }
 0x5c8   :  { %1825 = vmatpush.bf16.msra.mxu1 %v2217_v42  ;;  %1815 = vmatpush.bf16.msra.mxu0 %v2165_v17 }
 0x5c9   :  { %1802 = vmatpush.bf16.msra.mxu3 %v2161_v5 }
 0x5cb   :  { %1790 = vmatpush.bf16.msra.mxu2 %v2141_v33 }
 0x5cc   :  { %1826 = vmatpush.bf16.msra.mxu1 %v2201_v8  ;;  %1816 = vmatpush.bf16.msra.mxu0 %v2149_v56 }
 0x5cd   :  { %1803 = vmatpush.bf16.msra.mxu3 %v2145_v60 }
 0x5d0   :  { %1827 = vmatpush.bf16.msra.mxu1 %v2185_v39 }
 0x5d4   :  { %1828 = vmatpush.bf16.msra.mxu1 %v2169_v13 }
 0x5d8   :  { %1829 = vmatpush.bf16.msra.mxu1 %v2153_v59 }
 0x63f   :  { %v1493_v40 = vpop.f32.mrf.mxu0 }
 0x640   :  { %v1494_v47 = vadd.f32 %v2370_v20, %v1493_v40 }
 0x642   :  { %v1497_v48 = vmax.f32 %v1494_v47, 0.0 }
 0x644   :  { %v1498_v51 = vpack.c.bf16 %v1497_v48, %v1497_v48 }
 0x646   :  { %1573 = vmatmul.bf16.vlgmr.msrb.gmra.mxu1 %v1498_v51 }
 0x647   :  { %v1495_v58 = vpop.f32.mrf.mxu0 }
 0x6c3   :  { %v1574_v57 = vpop.f32.mrf.mxu1 }
 0x6c4   :  { %v1575_v15 = vadd.f32 %v2371_v28, %v1574_v57 }
 0x6c6   :  { %v1578_v63 = vmax.f32 %v1575_v15, 0.0 }
 0x6c8   :  { %v1579_v21 = vpack.c.bf16 %v1578_v63, %v1578_v63 }
 0x6ca   :  { %1791 = vmatmul.bf16.vlgmr.msra.gmra.mxu2 %v1579_v21  ;;  %1804 = vmatmul.bf16.vlgmr.msra.gmra.mxu3 %v1579_v21 }
 0x6cb   :  { %1817 = vmatmul.bf16.vlgmr.msra.gmra.mxu0 %v1579_v21  ;;  %1830 = vmatmul.bf16.vlgmr.msra.gmra.mxu1 %v1579_v21  ;;  %v1576_v4 = vpop.f32.mrf.mxu1 }
 0x748   :  { %v1818_v46 = vpop.f32.mrf.mxu0  ;;  %v1831_v34 = vpop.f32.mrf.mxu1 }
 0x749   :  { %v1819_v38 = vadd.f32 %v1818_v46, %v1617_v29  ;;  %v1832_v42 = vadd.f32 %v1831_v34, %v1618_v7 }
 0x74b   :  { %1837 = vst [vmem:[#allocation7 + $0x10] sm:$0xff] %v1819_v38 }
 0x74c   :  { %1838 = vst [vmem:[#allocation7 + $0x18] sm:$0xff] %v1832_v42 }
 0x74d   :  { %v1792_v50 = vpop.f32.mrf.mxu2  ;;  %v1805_v53 = vpop.f32.mrf.mxu3 }
 0x74e   :  { %v1793_v54 = vadd.f32 %v1792_v50, %v1615_v43  ;;  %v1806_v61 = vadd.f32 %v1805_v53, %v1616_v49 }
 0x750   :  { %1835 = vst [vmem:[#allocation7] sm:$0xff] %v1793_v54  ;;  %v1820_v62 = vpop.f32.mrf.mxu0  ;;  %v1833_v1 = vpop.f32.mrf.mxu1 }
 0x751   :  { %1836 = vst [vmem:[#allocation7 + $0x8] sm:$0xff] %v1806_v61 }
 0x752   :  { %1849 = dma.vmem_to_hbm [thread:$0]  %s1845_s17, 512, %s1847_s20, [#allocation4]  }
 0x755   :  { %v1794_v2 = vpop.f32.mrf.mxu2  ;;  %v1807_v9 = vpop.f32.mrf.mxu3 }
 0x756   :  { %2576 = dma.done.wait [#allocation4], 512  }
 0x757   :  { %2577 = vsyncadd [#allocation4], 4294966784 }
 0x758   :  { %1854 = vsyncpa [#allocation3], 1 }
 0x759   :  { %1855 = vsyncpa [#allocation6], 1 }
 0x75a   :  { %1856 = vsyncpa [#allocation4], 1 }

</bundles_post_ra>
